<compile_context>
chip_gen: v7x
topology: tpu7x:2x2x1
jax: 0.10.0
libtpu: 0.0.40
codegen_flags: <defaults>
</compile_context>

<pallas_src>
import numpy as np
import jax
import jax.numpy as jnp
from jax import lax
from jax.experimental import pallas as pl
from jax.experimental.pallas import tpu as pltpu


# ----------------------------------------------------------------------------
# Generic dense layer:  y = x @ W + b   (W stored [in, out], bf16).
# One launch over the whole batch; weight block is full-width when it fits.
# ----------------------------------------------------------------------------
def _linear_kernel(x_ref, w_ref, b_ref, o_ref):
    x16 = x_ref[...].astype(jnp.bfloat16)
    o_ref[...] = (
        jnp.dot(x16, w_ref[...], preferred_element_type=jnp.float32) + b_ref[...]
    ).astype(o_ref.dtype)


def pallas_linear(x, w_t, b, tile_n=None):
    n, d_in = x.shape
    d_out = w_t.shape[1]
    if tile_n is None:
        # keep the whole weight slab resident when small (bf16 768x1024 = 1.5 MiB)
        tile_n = d_out if d_in * d_out * w_t.dtype.itemsize <= (8 << 20) else 512
    assert d_out % tile_n == 0
    b2 = b.reshape(1, d_out).astype(jnp.float32)
    return pl.pallas_call(
        _linear_kernel,
        out_shape=jax.ShapeDtypeStruct((n, d_out), jnp.float32),
        grid=(d_out // tile_n,),
        in_specs=[
            pl.BlockSpec((n, d_in), lambda j: (0, 0)),
            pl.BlockSpec((d_in, tile_n), lambda j: (0, j)),
            pl.BlockSpec((1, tile_n), lambda j: (0, j)),
        ],
        out_specs=pl.BlockSpec((n, tile_n), lambda j: (0, j)),
        compiler_params=pltpu.CompilerParams(
            dimension_semantics=("parallel",),
            vmem_limit_bytes=64 * 1024 * 1024),
    )(x, w_t, b2)


# ----------------------------------------------------------------------------
# Fused BiAttention (BCNet k=3 logits + v_mask + joint softmax) + BiResNet
# (glimpse residual loop).  One grid step = one batch element; the close/open
# weight stack is selected by the scalar-prefetched answer_target.
#   att[b,g,i,j] = softmax_{i,j}( relu(vWv+bv)[i,:] * h_mat[g,:] . relu(qWq+bq)[j,:] + h_bias[g] )
#   per glimpse g:  b_emb = sum_{i,j} vproj[i,:] * att[g,i,j] * qproj[j,:]
#                   q    += q_prj_g(b_emb)
#   feat = q.sum(seq)
# ----------------------------------------------------------------------------
def _ban_core_kernel(tgt_ref, v_ref, q_ref,
                     awv_ref, abv_ref, awq_ref, abq_ref, hmat_ref, hbias_ref,
                     rwv_ref, rbv_ref, rwq_ref, rbq_ref, rwp_ref, rbp_ref,
                     att_ref, feat_ref):
    del tgt_ref  # only consumed by the index_maps (close/open weight selection)
    f32, bf16 = jnp.float32, jnp.bfloat16
    nv = v_ref.shape[1]
    glimpse = hmat_ref.shape[1]

    v = v_ref[0]                          # [NV, VDIM] f32
    q = q_ref[0]                          # [NQ, HID]  f32
    v16 = v.astype(bf16)

    # ---------------- BiAttention ----------------
    v_ = jax.nn.relu(jnp.dot(v16, awv_ref[0], preferred_element_type=f32)
                     + abv_ref[0])                                    # [NV, 3H]
    q_ = jax.nn.relu(jnp.dot(q.astype(bf16), awq_ref[0],
                             preferred_element_type=f32) + abq_ref[0])  # [NQ, 3H]
    hmat = hmat_ref[0]                                                # [G, 3H]
    hbias = hbias_ref[0]                                              # [G, 1]

    # All-glimpse bilinear logits in ONE MXU call: stack (v_ * h_mat[g]) along
    # the row axis -> [G*NV, 3H], contract against q_ -> [G*NV, NQ].
    hg = jnp.concatenate([v_ * hmat[g:g + 1, :] for g in range(glimpse)], axis=0)
    logits = lax.dot_general(hg.astype(bf16), q_.astype(bf16),
                             (((1,), (1,)), ((), ())),
                             preferred_element_type=f32)              # [G*NV, NQ]

    # v_mask: rows whose visual feature is all zero (v.abs().sum(-1) == 0)
    vzero = (jnp.sum(jnp.abs(v), axis=1, keepdims=True) == 0.0)       # [NV, 1]

    # Joint softmax over (NV*NQ) per glimpse; finite -1e30 mask avoids NaN
    # when every row is masked.  Keep att in registers for the resnet phase.
    att_list = []
    for g in range(glimpse):
        lg = logits[g * nv:(g + 1) * nv, :] + hbias[g:g + 1, 0:1]     # [NV, NQ]
        lg = jnp.where(vzero, -1e30, lg)
        m = jnp.max(jnp.max(lg, axis=1, keepdims=True), axis=0, keepdims=True)
        e = jnp.exp(lg - m)
        s = jnp.sum(jnp.sum(e, axis=1, keepdims=True), axis=0, keepdims=True)
        p = e * pl.reciprocal(s, approx=True)                         # [NV, NQ]
        att_ref[0, g] = p
        att_list.append(p)

    # ---------------- BiResNet (sequential glimpse residual) ----------------
    q_cur = q                                                         # f32 [NQ, HID]
    for g in range(glimpse):
        v_g = jax.nn.relu(jnp.dot(v16, rwv_ref[0, g],
                                  preferred_element_type=f32) + rbv_ref[0, g])   # [NV, HID]
        q_g = jax.nn.relu(jnp.dot(q_cur.astype(bf16), rwq_ref[0, g],
                                  preferred_element_type=f32) + rbq_ref[0, g])   # [NQ, HID]
        tmp = lax.dot_general(att_list[g].astype(bf16), v_g.astype(bf16),
                              (((0,), (0,)), ((), ())),
                              preferred_element_type=f32)                        # [NQ, HID]
        b_emb = jnp.sum(tmp * q_g, axis=0, keepdims=True)                        # [1, HID]
        qp = jnp.dot(b_emb.astype(bf16), rwp_ref[0, g],
                     preferred_element_type=f32) + rbp_ref[0, g]                 # [1, HID]
        q_cur = q_cur + qp
    feat_ref[0] = jnp.sum(q_cur, axis=0, keepdims=True)               # [1, HID]


def ban_core(params, v_emb, q_emb, answer_target01, glimpse):
    b, nv, vdim = v_emb.shape
    _, nq, hid = q_emb.shape
    pa, pr = params["att"], params["resnet"]
    h3 = pa["wv"].shape[2]

    grid_spec = pltpu.PrefetchScalarGridSpec(
        num_scalar_prefetch=1,
        grid=(b,),
        in_specs=[
            pl.BlockSpec((1, nv, vdim), lambda i, tgt: (i, 0, 0)),
            pl.BlockSpec((1, nq, hid), lambda i, tgt: (i, 0, 0)),
            # attention weights (close/open stacked on dim 0, picked by tgt[i])
            pl.BlockSpec((1, vdim, h3), lambda i, tgt: (tgt[i], 0, 0)),
            pl.BlockSpec((1, 1, h3), lambda i, tgt: (tgt[i], 0, 0)),
            pl.BlockSpec((1, hid, h3), lambda i, tgt: (tgt[i], 0, 0)),
            pl.BlockSpec((1, 1, h3), lambda i, tgt: (tgt[i], 0, 0)),
            pl.BlockSpec((1, glimpse, h3), lambda i, tgt: (tgt[i], 0, 0)),
            pl.BlockSpec((1, glimpse, 1), lambda i, tgt: (tgt[i], 0, 0)),
            # resnet weights
            pl.BlockSpec((1, glimpse, vdim, hid), lambda i, tgt: (tgt[i], 0, 0, 0)),
            pl.BlockSpec((1, glimpse, 1, hid), lambda i, tgt: (tgt[i], 0, 0, 0)),
            pl.BlockSpec((1, glimpse, hid, hid), lambda i, tgt: (tgt[i], 0, 0, 0)),
            pl.BlockSpec((1, glimpse, 1, hid), lambda i, tgt: (tgt[i], 0, 0, 0)),
            pl.BlockSpec((1, glimpse, hid, hid), lambda i, tgt: (tgt[i], 0, 0, 0)),
            pl.BlockSpec((1, glimpse, 1, hid), lambda i, tgt: (tgt[i], 0, 0, 0)),
        ],
        out_specs=(
            pl.BlockSpec((1, glimpse, nv, nq), lambda i, tgt: (i, 0, 0, 0)),
            pl.BlockSpec((1, 1, hid), lambda i, tgt: (i, 0, 0)),
        ),
    )
    att, feat = pl.pallas_call(
        _ban_core_kernel,
        grid_spec=grid_spec,
        out_shape=(
            jax.ShapeDtypeStruct((b, glimpse, nv, nq), jnp.float32),
            jax.ShapeDtypeStruct((b, 1, hid), jnp.float32),
        ),
        compiler_params=pltpu.CompilerParams(
            dimension_semantics=("parallel",),
            # at production dims (hid=1024, k=3) keep weights bf16 and re-tile
            # for v7x's 64 MiB physical VMEM; raise toward ~96 MiB on v5e/v6e.
            vmem_limit_bytes=64 * 1024 * 1024),
    )(answer_target01, v_emb, q_emb,
      pa["wv"], pa["bv"], pa["wq"], pa["bq"], pa["h_mat"], pa["h_bias"],
      pr["wv"], pr["bv"], pr["wq"], pr["bq"], pr["wp"], pr["bp"])
    return att, feat.reshape(b, hid)


# ----------------------------------------------------------------------------
# Parameter init (deterministic, synthetic — no checkpoint loading).
# Index 0 = close branch, 1 = open branch.
# ----------------------------------------------------------------------------
def init_params(key, v_dim, hid, glimpse, img_flat, seq_len, k=3):
    keys = iter(jax.random.split(key, 64))

    def w(shape, scale=0.05, dtype=jnp.float32):
        return (scale * jax.random.normal(next(keys), shape)).astype(dtype)

    h3 = hid * k
    bf16 = jnp.bfloat16
    return dict(
        att=dict(
            wv=w((2, v_dim, h3), dtype=bf16), bv=w((2, 1, h3)),
            wq=w((2, hid, h3), dtype=bf16), bq=w((2, 1, h3)),
            h_mat=w((2, glimpse, h3)), h_bias=w((2, glimpse, 1))),
        resnet=dict(
            wv=w((2, glimpse, v_dim, hid), dtype=bf16), bv=w((2, glimpse, 1, hid)),
            wq=w((2, glimpse, hid, hid), dtype=bf16), bq=w((2, glimpse, 1, hid)),
            wp=w((2, glimpse, hid, hid), dtype=bf16), bp=w((2, glimpse, 1, hid))),
        question_linear=dict(w=w((768, 1024), dtype=bf16), b=w((1024,))),
        image_linear=dict(w=w((768, 128), dtype=bf16), b=w((128,))),   # unused in forward
        D_reduction=dict(w=w((256, 128), dtype=bf16), b=w((128,))),    # unused in forward
        albef_pv=w((img_flat, 768), 0.02),
        albef_pq=w((seq_len, 768), 0.02),
    )


# ----------------------------------------------------------------------------
# seperate / seperate_C index computation (host Python loop, like PyTorch).
# ----------------------------------------------------------------------------
def seperate_indices(answer_target):
    idx_open, idx_close = [], []
    for i, t in enumerate(np.asarray(answer_target).tolist()):
        if t == 0:
            idx_close.append(i)
        else:
            idx_open.append(i)
    return idx_close, idx_open


# ----------------------------------------------------------------------------
# BAN_Model.forward  (args.test_C=True, vis_feature='maml',
#                     add_typeatt1=add_typeatt2=False path)
# ----------------------------------------------------------------------------
def ban_model_forward(params, v, q, a, answer_target, q_mask, knowledge,
                      t_queue, k_input_queue, k_mask_queue, split):
    idx_close, idx_open = seperate_indices(answer_target)
    ic = jnp.asarray(idx_close, dtype=jnp.int32)   # explicit int32: safe if empty
    io = jnp.asarray(idx_open, dtype=jnp.int32)
    b = q.shape[0]
    # TODO(synk): self.ALBEF is an external pretrained BLIP-VQA transformer with no
    # in-script Pallas equivalent; substitute a fixed deterministic projection of
    # (v[0], q) into the 768-d cross-modal embedding space (output_close/output_open).
    v_flat = v[0].reshape(b, -1).astype(jnp.float32)
    cme = jnp.tanh(v_flat @ params["albef_pv"]
                   + q.astype(jnp.float32) @ params["albef_pq"])       # [B, 768]

    # question_linear (nn.Linear(768, 1024)) — ONE Pallas launch on the full
    # batch, then split close/open on the host (mathematically identical).
    last_output = pallas_linear(cme, params["question_linear"]["w"],
                                params["question_linear"]["b"])
    last_output_close = last_output[ic]
    last_output_open = last_output[io]

    # seperate_C(a, answer_target)
    a_open = a[io, 56:487]
    a_close = a[ic, :56]

    return (last_output_close, last_output_open, a_close, a_open,
            t_queue, k_input_queue, k_mask_queue)


# ----------------------------------------------------------------------------
# BAN core (BiAttention + BiResNet hot path used by forward_classify/classify):
# one fused pallas_call over the whole batch; answer_target selects the
# close/open weight stack per element.  (BiAttention's `logits` are discarded
# by every caller in BAN_Model, so they are not materialized.)
# ----------------------------------------------------------------------------
def ban_attention_core(params, v_emb, q_emb, a, answer_target, glimpse):
    tgt = jnp.asarray((np.asarray(answer_target) != 0).astype(np.int32))  # 0=close, 1=open
    att, feat = ban_core(params, v_emb, q_emb, tgt, glimpse)
    idx_close, idx_open = seperate_indices(answer_target)
    ic = jnp.asarray(idx_close, dtype=jnp.int32)
    io = jnp.asarray(idx_open, dtype=jnp.int32)
    feat_close, feat_open = feat[ic], feat[io]
    att_close, att_open = att[ic], att[io]
    a_close = a[ic, :56]
    a_open = a[io, 56:487]
    return feat_close, feat_open, a_close, a_open, att_close, att_open


# ----------------------------------------------------------------------------
# Pure-JAX reference for one branch (correctness checks).
# ----------------------------------------------------------------------------
def ref_branch(params, v, q, glimpse, branch):
    pa = {k: x[branch].astype(jnp.float32) for k, x in params["att"].items()}
    pr = {k: x[branch].astype(jnp.float32) for k, x in params["resnet"].items()}
    v_ = jax.nn.relu(v @ pa["wv"] + pa["bv"])
    q_ = jax.nn.relu(q @ pa["wq"] + pa["bq"])
    logits = jnp.einsum("bvd,gd,bqd->bgvq", v_, pa["h_mat"], q_) \
        + pa["h_bias"].reshape(1, glimpse, 1, 1)
    mask = (jnp.sum(jnp.abs(v), axis=2) == 0)[:, None, :, None]
    logits = jnp.where(mask, -1e30, logits)
    bsz, _, nv, nq = logits.shape
    att = jax.nn.softmax(logits.reshape(bsz, glimpse, nv * nq), axis=2)
    att = att.reshape(bsz, glimpse, nv, nq)
    q_cur = q
    for g in range(glimpse):
        vg = jax.nn.relu(v @ pr["wv"][g] + pr["bv"][g])
        qg = jax.nn.relu(q_cur @ pr["wq"][g] + pr["bq"][g])
        b_emb = jnp.einsum("bvk,bvq,bqk->bk", vg, att[:, g], qg)
        qp = b_emb[:, None, :] @ pr["wp"][g] + pr["bp"][g]
        q_cur = q_cur + qp
    return att, jnp.sum(q_cur, axis=1)


if __name__ == "__main__":
    B, NV, VDIM, NQ, HID, G, IMG = 4, 16, 64, 8, 32, 2, 16
    key = jax.random.PRNGKey(0)
    pkey, *ks = jax.random.split(key, 8)
    params = init_params(pkey, VDIM, HID, G, img_flat=1 * IMG * IMG, seq_len=NQ)

    # inputs
    v_maml = jax.random.normal(ks[0], (B, 1, IMG, IMG), jnp.float32)   # v[0]
    v_ae = jax.random.normal(ks[1], (B, 1, IMG, IMG), jnp.float32)     # v[1]
    q_tokens = jax.random.randint(ks[2], (B, NQ), 0, 100)
    a = jax.random.uniform(ks[3], (B, 487), dtype=jnp.float32)
    answer_target = np.array([0, 1, 0, 1], dtype=np.int32)             # 2 close, 2 open
    q_mask = jnp.ones((B, NQ), jnp.int32)
    knowledge = jnp.zeros((B, NQ), jnp.int32)
    t_queue = jnp.zeros((4, 768), jnp.float32)
    k_input_queue = jnp.zeros((4, NQ), jnp.int32)
    k_mask_queue = jnp.ones((4, NQ), jnp.int32)

    # ---- BAN_Model.forward ----
    outs = ban_model_forward(params, (v_maml, v_ae), q_tokens, a, answer_target,
                             q_mask, knowledge, t_queue, k_input_queue,
                             k_mask_queue, split="test")
    outs = jax.block_until_ready(outs)
    loc, loo, a_close, a_open = outs[0], outs[1], outs[2], outs[3]
    assert loc.shape == (2, 1024) and loo.shape == (2, 1024)
    assert a_close.shape == (2, 56) and a_open.shape == (2, 431)

    # reference check for the question_linear Pallas kernel
    idx_close, idx_open = seperate_indices(answer_target)
    v_flat = v_maml.reshape(B, -1)
    cme = jnp.tanh(v_flat @ params["albef_pv"]
                   + q_tokens.astype(jnp.float32) @ params["albef_pq"])
    ref_lin = cme @ params["question_linear"]["w"].astype(jnp.float32) \
        + params["question_linear"]["b"]
    assert np.allclose(np.asarray(loc), np.asarray(ref_lin[np.array(idx_close)]),
                       rtol=2e-2, atol=2e-2)
    assert np.allclose(np.asarray(loo), np.asarray(ref_lin[np.array(idx_open)]),
                       rtol=2e-2, atol=2e-2)

    # ---- fused BiAttention + BiResNet (classify hot path) ----
    v_emb = jax.random.normal(ks[4], (B, NV, VDIM), jnp.float32)
    v_emb = v_emb.at[:, -2:, :].set(0.0)   # zeroed objects exercise the v_mask path
    q_emb = jax.random.normal(ks[5], (B, NQ, HID), jnp.float32)
    feat_close, feat_open, ac2, ao2, att_close, att_open = ban_attention_core(
        params, v_emb, q_emb, a, answer_target, G)
    jax.block_until_ready((feat_close, feat_open, att_close, att_open))
    assert feat_close.shape == (2, HID) and feat_open.shape == (2, HID)
    assert att_close.shape == (2, G, NV, NQ) and att_open.shape == (2, G, NV, NQ)

    # reference checks (both branches)
    ic, io = np.array(idx_close), np.array(idx_open)
    att_ref_c, feat_ref_c = ref_branch(params, v_emb[ic], q_emb[ic], G, branch=0)
    att_ref_o, feat_ref_o = ref_branch(params, v_emb[io], q_emb[io], G, branch=1)
    assert np.allclose(np.asarray(att_close), np.asarray(att_ref_c), rtol=2e-2, atol=2e-3)
    assert np.allclose(np.asarray(att_open), np.asarray(att_ref_o), rtol=2e-2, atol=2e-3)
    assert np.allclose(np.asarray(feat_close), np.asarray(feat_ref_c), rtol=2e-2, atol=2e-2)
    assert np.allclose(np.asarray(feat_open), np.asarray(feat_ref_o), rtol=2e-2, atol=2e-2)

    print("KERNEL_OK")
</pallas_src>

<mosaic_0001>
module attributes {stable_mosaic.version = 11 : i64} {
  func.func @_linear_kernel(%arg0: i32, %arg1: memref<4x768xf32, #tpu.memory_space<vmem>>, %arg2: memref<768x1024xbf16, #tpu.memory_space<vmem>>, %arg3: memref<1x1024xf32, #tpu.memory_space<vmem>>, %arg4: memref<4x1024xf32, #tpu.memory_space<vmem>>) attributes {dimension_semantics = [#tpu.dimension_semantics<parallel>], iteration_bounds = array<i64: 1>, scalar_prefetch = 0 : i64, scratch_operands = 0 : i64, tpu.core_type = #tpu.core_type<tc>, window_params = [{pipeline_mode = #tpu.pipeline_mode<synchronous>, transform_indices = @transform_0, window_bounds = array<i64: 4, 768>}, {transform_indices = @transform_1, window_bounds = array<i64: 768, 1024>}, {transform_indices = @transform_2, window_bounds = array<i64: 1, 1024>}, {transform_indices = @transform_3, window_bounds = array<i64: 4, 1024>}]} {
    %c0 = arith.constant 0 : index
    %c0_0 = arith.constant 0 : index
    %0 = vector.load %arg1[%c0, %c0_0] : memref<4x768xf32, #tpu.memory_space<vmem>>, vector<4x768xf32>
    %1 = arith.truncf %0 : vector<4x768xf32> to vector<4x768xbf16>
    %c0_1 = arith.constant 0 : index
    %c0_2 = arith.constant 0 : index
    %2 = vector.load %arg2[%c0_1, %c0_2] : memref<768x1024xbf16, #tpu.memory_space<vmem>>, vector<768x1024xbf16>
    %cst = arith.constant dense<0.000000e+00> : vector<4x1024xf32>
    %3 = tpu.matmul %1, %2, %cst {dimension_numbers = #tpu.dot_dimension_numbers<[1], [0], [0], [1], [0, 0, 1, 1], [], []>} : vector<4x768xbf16>, vector<768x1024xbf16>, vector<4x1024xf32> -> vector<4x1024xf32>
    %c0_3 = arith.constant 0 : index
    %c0_4 = arith.constant 0 : index
    %4 = vector.load %arg3[%c0_3, %c0_4] : memref<1x1024xf32, #tpu.memory_space<vmem>>, vector<1x1024xf32>
    %5 = vector.broadcast %4 : vector<1x1024xf32> to vector<4x1024xf32>
    %6 = arith.addf %3, %5 : vector<4x1024xf32>
    %c0_5 = arith.constant 0 : index
    %c0_6 = arith.constant 0 : index
    %7 = vector.load %arg4[%c0_5, %c0_6] : memref<4x1024xf32, #tpu.memory_space<vmem>>, vector<4x1024xf32>
    tpu.vector_store %arg4[%c0_5, %c0_6], %6 {strides = array<i32>} : memref<4x1024xf32, #tpu.memory_space<vmem>>, vector<4x1024xf32>,
    return
  }
  func.func @transform_0(%arg0: i32) -> (i32, i32) {
    %c0_i32 = arith.constant 0 : i32
    %c0_i32_0 = arith.constant 0 : i32
    %c0_i32_1 = arith.constant 0 : i32
    return %c0_i32, %c0_i32_0 : i32, i32
  }
  func.func @transform_1(%arg0: i32) -> (i32, i32) {
    %c0_i32 = arith.constant 0 : i32
    %c0_i32_0 = arith.constant 0 : i32
    return %c0_i32, %arg0 : i32, i32
  }
  func.func @transform_2(%arg0: i32) -> (i32, i32) {
    %c0_i32 = arith.constant 0 : i32
    %c0_i32_0 = arith.constant 0 : i32
    return %c0_i32, %arg0 : i32, i32
  }
  func.func @transform_3(%arg0: i32) -> (i32, i32) {
    %c0_i32 = arith.constant 0 : i32
    %c0_i32_0 = arith.constant 0 : i32
    return %c0_i32, %arg0 : i32, i32
  }
}

</mosaic_0001>

<bundles_post_ra>
// kernel: tpu_custom_call.1
= control target key start
LH: loop header
LB: loop body
LE: loop exit
PB: predicated region body
PF: predicated region fallthrough
CT: control target
= control target key end

     0   :  { %8 = vsyncpa [#allocation3], 0  ;;  %s3599_s0 = inlined_call_operand.hbm [shape: f32[4,768], index: 0, kind: input, shape index: {}]   ;;  %s3600_s1 = inlined_call_operand.hbm [shape: bf16[768,1024], index: 1, kind: input, shape index: {}]   ;;  %s3601_s2 = inlined_call_operand.hbm [shape: f32[1,1024], index: 2, kind: input, shape index: {}]   ;;  %s3602_s3 = inlined_call_operand.hbm [shape: f32[4,1024], index: 3, kind: output, shape index: {}]  }
   0x1   :  { %9 = vsyncpa [#allocation6], 0 }
   0x2   :  { %10 = vsyncpa [#allocation4], 0  ;;  %s3471_s12 = smov [#allocation5]   ;;  %s3377_s16 = scalar_lea.hbm %s3600_s1, 49152 }
   0x3   :  { %s26_s13 = sshll.u32 %s3471_s12, 4  ;;  %p3378_p0 = scmp.ne.s32.totalorder %s3600_s1, %s3377_s16  ;;  %s27_s13 = int_to_ptr.vmem [resolvable:$true] %s26_s13 }
   0x4   :  { %p3381_p1 = scmp.lt.u32.totalorder %s3377_s16, %s3600_s1 }
   0x6   :  { %p3383_p2 = pnand %p3381_p1, %p3378_p0 }
   0x8   :  { %3386 = shalt.err (!%p3383_p2)
}
   0x9   :  { %s3387_s21 = scalar_lea.vmem %s27_s13, 49152  ;;  %p3392_p4 = scmp.lt.s32.totalorder %s27_s13, %s27_s13 }
   0xa   :  { %p3388_p3 = scmp.ne.s32.totalorder %s27_s13, %s3387_s21  ;;  %p3393_p5 = scmp.lt.s32.totalorder %s3387_s21, %s3387_s21 }
   0xc   :  { %p3394_p6 = por %p3393_p5, %p3392_p4 }
   0xe   :  { %p3395_p7 = pnand %p3394_p6, %p3388_p3 }
  0x10   :  { %3398 = shalt.err (!%p3395_p7)
}
  0x11   :  { %s3472_s22 = smov 512   ;;  %s3473_s23 = smov 32  }
  0x12   :  { %32 = dma.hbm_to_vmem [thread:$0]  %s3600_s1, 49152, %s27_s13, [#allocation6], %s3472_s22, %s3472_s22, %s3473_s23  }
  0x13   :  { %s3474_s26 = smov [#allocation2]   ;;  %s3475_s28 = smov [#allocation7]  }
  0x14   :  { %s17_s27 = sshll.u32 %s3474_s26, 4  ;;  %s39_s29 = sshll.u32 %s3475_s28, 4  ;;  %s18_s27 = int_to_ptr.vmem [resolvable:$true] %s17_s27  ;;  %s40_s29 = int_to_ptr.vmem [resolvable:$true] %s39_s29 }
  0x15   :  { %s3399_s5 = scalar_lea.hbm %s3599_s0, 384 }
  0x16   :  { %p3400_p8 = scmp.ne.s32.totalorder %s3599_s0, %s3399_s5  ;;  %p3403_p9 = scmp.lt.u32.totalorder %s3399_s5, %s3599_s0 }
  0x18   :  { %p3405_p10 = pnand %p3403_p9, %p3400_p8 }
  0x1a   :  { %3408 = shalt.err (!%p3405_p10)
}
  0x1b   :  { %s3409_s1 = scalar_lea.vmem %s18_s27, 384  ;;  %p3414_p12 = scmp.lt.s32.totalorder %s18_s27, %s18_s27 }
  0x1c   :  { %p3410_p11 = scmp.ne.s32.totalorder %s18_s27, %s3409_s1  ;;  %p3415_p13 = scmp.lt.s32.totalorder %s3409_s1, %s3409_s1 }
  0x1e   :  { %p3416_p0 = por %p3415_p13, %p3414_p12 }
  0x20   :  { %p3417_p1 = pnand %p3416_p0, %p3410_p11 }
  0x22   :  { %3420 = shalt.err (!%p3417_p1)
}
  0x23   :  { %20 = dma.hbm_to_vmem [thread:$0]  %s3599_s0, 384, %s18_s27, [#allocation3]  }
  0x24   :  { %s3421_s14 = scalar_lea.hbm %s3601_s2, 128 }
  0x25   :  { %p3422_p2 = scmp.ne.s32.totalorder %s3601_s2, %s3421_s14  ;;  %p3425_p3 = scmp.lt.u32.totalorder %s3421_s14, %s3601_s2 }
  0x27   :  { %p3427_p4 = pnand %p3425_p3, %p3422_p2 }
  0x29   :  { %3430 = shalt.err (!%p3427_p4)
}
  0x2a   :  { %s3431_s19 = scalar_lea.vmem %s40_s29, 128  ;;  %p3436_p6 = scmp.lt.s32.totalorder %s40_s29, %s40_s29 }
  0x2b   :  { %p3432_p5 = scmp.ne.s32.totalorder %s40_s29, %s3431_s19  ;;  %p3437_p7 = scmp.lt.s32.totalorder %s3431_s19, %s3431_s19 }
  0x2d   :  { %p3438_p8 = por %p3437_p7, %p3436_p6 }
  0x2f   :  { %p3439_p9 = pnand %p3438_p8, %p3432_p5 }
  0x31   :  { %3442 = shalt.err (!%p3439_p9)
}
  0x32   :  { %42 = dma.hbm_to_vmem [thread:$0]  %s3601_s2, 128, %s40_s29, [#allocation6]  }
  0x33   :  { %3465 = dma.done.wait [#allocation3], 384  }
  0x34   :  { %3466 = vsyncadd [#allocation3], 4294966912 }
  0x35   :  { %3467 = dma.done.wait [#allocation6], 49280  }
  0x36   :  { %3468 = vsyncadd [#allocation6], 4294918016  ;;  %v70_v0 = vld [vmem:[#allocation5] sm:$0xff]  ;;  %v71_v2 = vld [vmem:[#allocation5 + $0x8] sm:$0xff]  ;;  %s3476_s2 = smov [#allocation8]  }
  0x37   :  { %v74_v1 = vld [vmem:[#allocation5 + $0x20] sm:$0xff]  ;;  %v75_v4 = vld [vmem:[#allocation5 + $0x28] sm:$0xff]  ;;  %s2934_s21 = sshll.u32 %s3476_s2, 4  ;;  %s2935_s21 = int_to_ptr.vmem [resolvable:$true] %s2934_s21 }
  0x38   :  { %v2945_v3 = vcombine.high %v70_v0, %v74_v1  ;;  %v2944_v5 = vcombine.low %v70_v0, %v74_v1  ;;  %v78_v6 = vld [vmem:[#allocation5 + $0x40] sm:$0xff]  ;;  %v2947_v8 = vcombine.high %v71_v2, %v75_v4  ;;  %v2946_v9 = vcombine.low %v71_v2, %v75_v4  ;;  %v79_v11 = vld [vmem:[#allocation5 + $0x48] sm:$0xff]  ;;  %s3443_s22 = scalar_lea.vmem %s2935_s21, 512  ;;  %p3448_p11 = scmp.lt.s32.totalorder %s2935_s21, %s2935_s21 }
  0x39   :  { %v82_v7 = vld [vmem:[#allocation5 + $0x60] sm:$0xff]  ;;  %v83_v12 = vld [vmem:[#allocation5 + $0x68] sm:$0xff]  ;;  %p3444_p10 = scmp.ne.s32.totalorder %s2935_s21, %s3443_s22  ;;  %p3449_p12 = scmp.lt.s32.totalorder %s3443_s22, %s3443_s22 }
  0x3a   :  { %v2953_v10 = vcombine.high %v78_v6, %v82_v7  ;;  %v86_v13 = vld [vmem:[#allocation5 + $0x80] sm:$0xff]  ;;  %2416 = vmatprep.subr.bf16.mxu0 %v2945_v3  ;;  %v2955_v14 = vcombine.high %v79_v11, %v83_v12  ;;  %v87_v16 = vld [vmem:[#allocation5 + $0x88] sm:$0xff]  ;;  %2539 = vmatprep.subr.bf16.mxu1 %v2947_v8  ;;  %v2952_v18 = vcombine.low %v78_v6, %v82_v7 }
  0x3b   :  { %v90_v15 = vld [vmem:[#allocation5 + $0xa0] sm:$0xff]  ;;  %v91_v17 = vld [vmem:[#allocation5 + $0xa8] sm:$0xff]  ;;  %2417 = vmatpush1.bf16.msra.mxu0 %v2944_v5  ;;  %2540 = vmatpush1.bf16.msra.mxu1 %v2946_v9  ;;  %v2954_v19 = vcombine.low %v79_v11, %v83_v12  ;;  %p3450_p13 = por %p3449_p12, %p3448_p11 }
  0x3c   :  { %2418 = vmatprep.subr.bf16.mxu0 %v2953_v10  ;;  %v2961_v20 = vcombine.high %v86_v13, %v90_v15  ;;  %2541 = vmatprep.subr.bf16.mxu1 %v2955_v14  ;;  %v2963_v21 = vcombine.high %v87_v16, %v91_v17  ;;  %v94_v22 = vld [vmem:[#allocation5 + $0xc0] sm:$0xff]  ;;  %v95_v24 = vld [vmem:[#allocation5 + $0xc8] sm:$0xff]  ;;  %v2960_v26 = vcombine.low %v86_v13, %v90_v15 }
  0x3d   :  { %v98_v23 = vld [vmem:[#allocation5 + $0xe0] sm:$0xff]  ;;  %v99_v25 = vld [vmem:[#allocation5 + $0xe8] sm:$0xff]  ;;  %v2962_v27 = vcombine.low %v87_v16, %v91_v17  ;;  %p3451_p0 = pnand %p3450_p13, %p3444_p10 }
  0x3e   :  { %v2969_v28 = vcombine.high %v94_v22, %v98_v23  ;;  %v2971_v29 = vcombine.high %v95_v24, %v99_v25  ;;  %v102_v30 = vld [vmem:[#allocation5 + $0x100] sm:$0xff]  ;;  %v103_v32 = vld [vmem:[#allocation5 + $0x108] sm:$0xff]  ;;  %v2968_v34 = vcombine.low %v94_v22, %v98_v23  ;;  %v2970_v35 = vcombine.low %v95_v24, %v99_v25 }
  0x3f   :  { %2419 = vmatpush1.bf16.msra.mxu0 %v2952_v18  ;;  %2542 = vmatpush1.bf16.msra.mxu1 %v2954_v19  ;;  %v106_v31 = vld [vmem:[#allocation5 + $0x120] sm:$0xff]  ;;  %v107_v33 = vld [vmem:[#allocation5 + $0x128] sm:$0xff] }
  0x40   :  { %2420 = vmatprep.subr.bf16.mxu0 %v2961_v20  ;;  %2543 = vmatprep.subr.bf16.mxu1 %v2963_v21  ;;  %v2977_v36 = vcombine.high %v102_v30, %v106_v31  ;;  %v2979_v37 = vcombine.high %v103_v32, %v107_v33  ;;  %v110_v38 = vld [vmem:[#allocation5 + $0x140] sm:$0xff]  ;;  %v111_v40 = vld [vmem:[#allocation5 + $0x148] sm:$0xff]  ;;  %v2976_v42 = vcombine.low %v102_v30, %v106_v31 }
  0x41   :  { %v114_v39 = vld [vmem:[#allocation5 + $0x160] sm:$0xff]  ;;  %v115_v41 = vld [vmem:[#allocation5 + $0x168] sm:$0xff]  ;;  %v2978_v43 = vcombine.low %v103_v32, %v107_v33 }
  0x42   :  { %v2985_v44 = vcombine.high %v110_v38, %v114_v39  ;;  %v2987_v45 = vcombine.high %v111_v40, %v115_v41  ;;  %v118_v46 = vld [vmem:[#allocation5 + $0x180] sm:$0xff]  ;;  %v119_v48 = vld [vmem:[#allocation5 + $0x188] sm:$0xff]  ;;  %v2984_v50 = vcombine.low %v110_v38, %v114_v39  ;;  %v2986_v51 = vcombine.low %v111_v40, %v115_v41 }
  0x43   :  { %2421 = vmatpush1.bf16.msra.mxu0 %v2960_v26  ;;  %2544 = vmatpush1.bf16.msra.mxu1 %v2962_v27  ;;  %v122_v47 = vld [vmem:[#allocation5 + $0x1a0] sm:$0xff]  ;;  %v123_v49 = vld [vmem:[#allocation5 + $0x1a8] sm:$0xff] }
  0x44   :  { %2422 = vmatprep.subr.bf16.mxu0 %v2969_v28  ;;  %2545 = vmatprep.subr.bf16.mxu1 %v2971_v29  ;;  %v2993_v52 = vcombine.high %v118_v46, %v122_v47  ;;  %v3533_v53 = vld [vmem:[#allocation2] sm:$0xff]  ;;  %v2995_v54 = vcombine.high %v119_v48, %v123_v49  ;;  %v126_v55 = vld [vmem:[#allocation5 + $0x1c0] sm:$0xff]  ;;  %v2992_v60 = vcombine.low %v118_v46, %v122_v47 }
  0x45   :  { %v130_v56 = vld [vmem:[#allocation5 + $0x1e0] sm:$0xff]  ;;  %v58_v57 = vcombine.high %v3533_v53, %v3533_v53  ;;  %v127_v58 = vld [vmem:[#allocation5 + $0x1c8] sm:$0xff]  ;;  %v2994_v62 = vcombine.low %v119_v48, %v123_v49 }
  0x46   :  { %v131_v59 = vld [vmem:[#allocation5 + $0x1e8] sm:$0xff]  ;;  %v3001_v63 = vcombine.high %v126_v55, %v130_v56  ;;  %v134_v1 = vld [vmem:[#allocation5 + $0x200] sm:$0xff]  ;;  %v3000_v5 = vcombine.low %v126_v55, %v130_v56 }
  0x47   :  { %2423 = vmatpush1.bf16.msra.mxu0 %v2968_v34  ;;  %2546 = vmatpush1.bf16.msra.mxu1 %v2970_v35  ;;  %v3537_v61 = vpack.c.bf16 %v58_v57, %v58_v57  ;;  %v3003_v0 = vcombine.high %v127_v58, %v131_v59  ;;  %v138_v2 = vld [vmem:[#allocation5 + $0x220] sm:$0xff]  ;;  %v135_v3 = vld [vmem:[#allocation5 + $0x208] sm:$0xff]  ;;  %v3002_v6 = vcombine.low %v127_v58, %v131_v59 }
  0x48   :  { %2424 = vmatprep.subr.bf16.mxu0 %v2977_v36  ;;  %2547 = vmatprep.subr.bf16.mxu1 %v2979_v37  ;;  %v139_v4 = vld [vmem:[#allocation5 + $0x228] sm:$0xff]  ;;  %v3009_v7 = vcombine.high %v134_v1, %v138_v2  ;;  %v142_v9 = vld [vmem:[#allocation5 + $0x240] sm:$0xff]  ;;  %v3008_v13 = vcombine.low %v134_v1, %v138_v2 }
  0x49   :  { %2448 = vmatprep.mubr.bf16.mxu0 %v3537_v61  ;;  %2571 = vmatprep.mubr.bf16.mxu1 %v3537_v61  ;;  %v3011_v8 = vcombine.high %v135_v3, %v139_v4  ;;  %v146_v10 = vld [vmem:[#allocation5 + $0x260] sm:$0xff]  ;;  %v143_v11 = vld [vmem:[#allocation5 + $0x248] sm:$0xff]  ;;  %v3010_v14 = vcombine.low %v135_v3, %v139_v4 }
  0x4a   :  { %v147_v12 = vld [vmem:[#allocation5 + $0x268] sm:$0xff]  ;;  %v3017_v15 = vcombine.high %v142_v9, %v146_v10  ;;  %v150_v17 = vld [vmem:[#allocation5 + $0x280] sm:$0xff]  ;;  %v3016_v21 = vcombine.low %v142_v9, %v146_v10 }
  0x4b   :  { %2425 = vmatpush1.bf16.msra.mxu0 %v2976_v42  ;;  %2548 = vmatpush1.bf16.msra.mxu1 %v2978_v43  ;;  %v3019_v16 = vcombine.high %v143_v11, %v147_v12  ;;  %v154_v18 = vld [vmem:[#allocation5 + $0x2a0] sm:$0xff]  ;;  %v151_v19 = vld [vmem:[#allocation5 + $0x288] sm:$0xff]  ;;  %v3018_v22 = vcombine.low %v143_v11, %v147_v12 }
  0x4c   :  { %2426 = vmatprep.subr.bf16.mxu0 %v2985_v44  ;;  %2549 = vmatprep.subr.bf16.mxu1 %v2987_v45  ;;  %v155_v20 = vld [vmem:[#allocation5 + $0x2a8] sm:$0xff]  ;;  %v3025_v23 = vcombine.high %v150_v17, %v154_v18  ;;  %v158_v25 = vld [vmem:[#allocation5 + $0x2c0] sm:$0xff]  ;;  %v3024_v29 = vcombine.low %v150_v17, %v154_v18 }
  0x4d   :  { %v3027_v24 = vcombine.high %v151_v19, %v155_v20  ;;  %v162_v26 = vld [vmem:[#allocation5 + $0x2e0] sm:$0xff]  ;;  %v159_v27 = vld [vmem:[#allocation5 + $0x2c8] sm:$0xff]  ;;  %v3026_v30 = vcombine.low %v151_v19, %v155_v20 }
  0x4e   :  { %v163_v28 = vld [vmem:[#allocation5 + $0x2e8] sm:$0xff]  ;;  %v3033_v31 = vcombine.high %v158_v25, %v162_v26  ;;  %v166_v33 = vld [vmem:[#allocation5 + $0x300] sm:$0xff]  ;;  %v3032_v37 = vcombine.low %v158_v25, %v162_v26 }
  0x4f   :  { %2427 = vmatpush1.bf16.msra.mxu0 %v2984_v50  ;;  %2550 = vmatpush1.bf16.msra.mxu1 %v2986_v51  ;;  %v3035_v32 = vcombine.high %v159_v27, %v163_v28  ;;  %v170_v34 = vld [vmem:[#allocation5 + $0x320] sm:$0xff]  ;;  %v167_v35 = vld [vmem:[#allocation5 + $0x308] sm:$0xff]  ;;  %v3034_v38 = vcombine.low %v159_v27, %v163_v28 }
  0x50   :  { %2428 = vmatprep.subr.bf16.mxu0 %v2993_v52  ;;  %2551 = vmatprep.subr.bf16.mxu1 %v2995_v54  ;;  %v171_v36 = vld [vmem:[#allocation5 + $0x328] sm:$0xff]  ;;  %v3041_v39 = vcombine.high %v166_v33, %v170_v34  ;;  %v174_v41 = vld [vmem:[#allocation5 + $0x340] sm:$0xff]  ;;  %v3040_v45 = vcombine.low %v166_v33, %v170_v34 }
  0x51   :  { %v3043_v40 = vcombine.high %v167_v35, %v171_v36  ;;  %v178_v42 = vld [vmem:[#allocation5 + $0x360] sm:$0xff]  ;;  %v175_v43 = vld [vmem:[#allocation5 + $0x348] sm:$0xff]  ;;  %v3042_v46 = vcombine.low %v167_v35, %v171_v36 }
  0x52   :  { %v179_v44 = vld [vmem:[#allocation5 + $0x368] sm:$0xff]  ;;  %v3049_v47 = vcombine.high %v174_v41, %v178_v42  ;;  %v182_v49 = vld [vmem:[#allocation5 + $0x380] sm:$0xff]  ;;  %v3048_v54 = vcombine.low %v174_v41, %v178_v42 }
  0x53   :  { %2429 = vmatpush1.bf16.msra.mxu0 %v2992_v60  ;;  %2552 = vmatpush1.bf16.msra.mxu1 %v2994_v62  ;;  %v3051_v48 = vcombine.high %v175_v43, %v179_v44  ;;  %v186_v50 = vld [vmem:[#allocation5 + $0x3a0] sm:$0xff]  ;;  %v183_v51 = vld [vmem:[#allocation5 + $0x388] sm:$0xff]  ;;  %v3050_v55 = vcombine.low %v175_v43, %v179_v44 }
  0x54   :  { %2430 = vmatprep.subr.bf16.mxu0 %v3001_v63  ;;  %2553 = vmatprep.subr.bf16.mxu1 %v3003_v0  ;;  %v187_v52 = vld [vmem:[#allocation5 + $0x3a8] sm:$0xff]  ;;  %v3057_v56 = vcombine.high %v182_v49, %v186_v50  ;;  %v190_v58 = vld [vmem:[#allocation5 + $0x3c0] sm:$0xff]  ;;  %v3056_v63 = vcombine.low %v182_v49, %v186_v50 }
  0x55   :  { %v3059_v57 = vcombine.high %v183_v51, %v187_v52  ;;  %v194_v59 = vld [vmem:[#allocation5 + $0x3e0] sm:$0xff]  ;;  %v191_v60 = vld [vmem:[#allocation5 + $0x3c8] sm:$0xff]  ;;  %v3058_v0 = vcombine.low %v183_v51, %v187_v52 }
  0x56   :  { %v195_v62 = vld [vmem:[#allocation5 + $0x3e8] sm:$0xff]  ;;  %v3065_v1 = vcombine.high %v190_v58, %v194_v59  ;;  %v198_v3 = vld [vmem:[#allocation5 + $0x400] sm:$0xff] }
  0x57   :  { %2431 = vmatpush1.bf16.msra.mxu0 %v3000_v5  ;;  %2554 = vmatpush1.bf16.msra.mxu1 %v3002_v6  ;;  %v3067_v2 = vcombine.high %v191_v60, %v195_v62  ;;  %v202_v4 = vld [vmem:[#allocation5 + $0x420] sm:$0xff]  ;;  %v199_v5 = vld [vmem:[#allocation5 + $0x408] sm:$0xff]  ;;  %v3066_v9 = vcombine.low %v191_v60, %v195_v62 }
  0x58   :  { %2432 = vmatprep.subr.bf16.mxu0 %v3009_v7  ;;  %2555 = vmatprep.subr.bf16.mxu1 %v3011_v8  ;;  %v203_v6 = vld [vmem:[#allocation5 + $0x428] sm:$0xff]  ;;  %v3541_v7 = vld [vmem:[#allocation2 + $0x8] sm:$0xff]  ;;  %v3064_v8 = vcombine.low %v190_v58, %v194_v59  ;;  %v3073_v10 = vcombine.high %v198_v3, %v202_v4  ;;  %v206_v12 = vld [vmem:[#allocation5 + $0x440] sm:$0xff]  ;;  %v3072_v18 = vcombine.low %v198_v3, %v202_v4 }
  0x59   :  { %v3075_v11 = vcombine.high %v199_v5, %v203_v6  ;;  %v211_v17 = vld [vmem:[#allocation5 + $0x468] sm:$0xff]  ;;  %v3074_v19 = vcombine.low %v199_v5, %v203_v6 }
  0x5a   :  { %v215_v25 = vld [vmem:[#allocation5 + $0x488] sm:$0xff] }
  0x5b   :  { %2433 = vmatpush1.bf16.msra.mxu0 %v3008_v13  ;;  %2556 = vmatpush1.bf16.msra.mxu1 %v3010_v14  ;;  %v210_v13 = vld [vmem:[#allocation5 + $0x460] sm:$0xff]  ;;  %v59_v14 = vcombine.high %v3541_v7, %v3541_v7  ;;  %v219_v26 = vld [vmem:[#allocation5 + $0x4a8] sm:$0xff] }
  0x5c   :  { %2434 = vmatprep.subr.bf16.mxu0 %v3017_v15  ;;  %2557 = vmatprep.subr.bf16.mxu1 %v3019_v16  ;;  %v3547_v15 = vpack.c.bf16 %v3533_v53, %v3533_v53  ;;  %v207_v16 = vld [vmem:[#allocation5 + $0x448] sm:$0xff]  ;;  %v3081_v20 = vcombine.high %v206_v12, %v210_v13  ;;  %v3080_v53 = vcombine.low %v206_v12, %v210_v13 }
  0x5d   :  { %v3082_v27 = vcombine.low %v207_v16, %v211_v17  ;;  %v227_v33 = vld [vmem:[#allocation5 + $0x4e8] sm:$0xff]  ;;  %v3090_v35 = vcombine.low %v215_v25, %v219_v26 }
  0x5e   :  { %v235_v41 = vld [vmem:[#allocation5 + $0x528] sm:$0xff] }
  0x5f   :  { %2435 = vmatpush1.bf16.msra.mxu0 %v3016_v21  ;;  %2558 = vmatpush1.bf16.msra.mxu1 %v3018_v22  ;;  %v3083_v21 = vcombine.high %v207_v16, %v211_v17  ;;  %v214_v22 = vld [vmem:[#allocation5 + $0x480] sm:$0xff]  ;;  %v243_v49 = vld [vmem:[#allocation5 + $0x568] sm:$0xff] }
  0x60   :  { %2436 = vmatprep.subr.bf16.mxu0 %v3025_v23  ;;  %2559 = vmatprep.subr.bf16.mxu1 %v3027_v24  ;;  %v218_v23 = vld [vmem:[#allocation5 + $0x4a0] sm:$0xff]  ;;  %v3549_v24 = vpack.c.bf16 %v59_v14, %v59_v14  ;;  %v251_v58 = vld [vmem:[#allocation5 + $0x5a8] sm:$0xff] }
  0x61   :  { %v3089_v28 = vcombine.high %v214_v22, %v218_v23  ;;  %v3088_v34 = vcombine.low %v214_v22, %v218_v23  ;;  %v259_v3 = vld [vmem:[#allocation5 + $0x5e8] sm:$0xff] }
  0x62   :  { %v267_v12 = vld [vmem:[#allocation5 + $0x628] sm:$0xff] }
  0x63   :  { %2437 = vmatpush1.bf16.msra.mxu0 %v3024_v29  ;;  %2560 = vmatpush1.bf16.msra.mxu1 %v3026_v30  ;;  %v3091_v29 = vcombine.high %v215_v25, %v219_v26  ;;  %v222_v30 = vld [vmem:[#allocation5 + $0x4c0] sm:$0xff] }
  0x64   :  { %2438 = vmatprep.subr.bf16.mxu0 %v3033_v31  ;;  %2561 = vmatprep.subr.bf16.mxu1 %v3035_v32  ;;  %v226_v31 = vld [vmem:[#allocation5 + $0x4e0] sm:$0xff]  ;;  %v223_v32 = vld [vmem:[#allocation5 + $0x4c8] sm:$0xff] }
  0x65   :  { %v3097_v36 = vcombine.high %v222_v30, %v226_v31  ;;  %v3096_v42 = vcombine.low %v222_v30, %v226_v31  ;;  %v3098_v43 = vcombine.low %v223_v32, %v227_v33 }
  0x67   :  { %2439 = vmatpush1.bf16.msra.mxu0 %v3032_v37  ;;  %2562 = vmatpush1.bf16.msra.mxu1 %v3034_v38  ;;  %v3099_v37 = vcombine.high %v223_v32, %v227_v33  ;;  %v230_v38 = vld [vmem:[#allocation5 + $0x500] sm:$0xff] }
  0x68   :  { %2440 = vmatprep.subr.bf16.mxu0 %v3041_v39  ;;  %2563 = vmatprep.subr.bf16.mxu1 %v3043_v40  ;;  %v234_v39 = vld [vmem:[#allocation5 + $0x520] sm:$0xff]  ;;  %v231_v40 = vld [vmem:[#allocation5 + $0x508] sm:$0xff] }
  0x69   :  { %v3105_v44 = vcombine.high %v230_v38, %v234_v39  ;;  %v3104_v50 = vcombine.low %v230_v38, %v234_v39  ;;  %v3106_v51 = vcombine.low %v231_v40, %v235_v41 }
  0x6b   :  { %2441 = vmatpush1.bf16.msra.mxu0 %v3040_v45  ;;  %2564 = vmatpush1.bf16.msra.mxu1 %v3042_v46  ;;  %v3107_v45 = vcombine.high %v231_v40, %v235_v41  ;;  %v238_v46 = vld [vmem:[#allocation5 + $0x540] sm:$0xff] }
  0x6c   :  { %2442 = vmatprep.subr.bf16.mxu0 %v3049_v47  ;;  %2565 = vmatprep.subr.bf16.mxu1 %v3051_v48  ;;  %v242_v47 = vld [vmem:[#allocation5 + $0x560] sm:$0xff]  ;;  %v239_v48 = vld [vmem:[#allocation5 + $0x548] sm:$0xff] }
  0x6d   :  { %v3113_v52 = vcombine.high %v238_v46, %v242_v47  ;;  %v3112_v59 = vcombine.low %v238_v46, %v242_v47  ;;  %v3114_v60 = vcombine.low %v239_v48, %v243_v49 }
  0x6f   :  { %2443 = vmatpush1.bf16.msra.mxu0 %v3048_v54  ;;  %2566 = vmatpush1.bf16.msra.mxu1 %v3050_v55  ;;  %v3115_v54 = vcombine.high %v239_v48, %v243_v49  ;;  %v246_v55 = vld [vmem:[#allocation5 + $0x580] sm:$0xff] }
  0x70   :  { %2444 = vmatprep.subr.bf16.mxu0 %v3057_v56  ;;  %2567 = vmatprep.subr.bf16.mxu1 %v3059_v57  ;;  %v250_v56 = vld [vmem:[#allocation5 + $0x5a0] sm:$0xff]  ;;  %v247_v57 = vld [vmem:[#allocation5 + $0x588] sm:$0xff] }
  0x71   :  { %v3121_v62 = vcombine.high %v246_v55, %v250_v56  ;;  %v3120_v4 = vcombine.low %v246_v55, %v250_v56  ;;  %v3122_v5 = vcombine.low %v247_v57, %v251_v58 }
  0x73   :  { %2445 = vmatpush1.bf16.msra.mxu0 %v3056_v63  ;;  %2568 = vmatpush1.bf16.msra.mxu1 %v3058_v0  ;;  %v3123_v63 = vcombine.high %v247_v57, %v251_v58  ;;  %v254_v0 = vld [vmem:[#allocation5 + $0x5c0] sm:$0xff] }
  0x74   :  { %2446 = vmatprep.subr.bf16.mxu0 %v3065_v1  ;;  %2569 = vmatprep.subr.bf16.mxu1 %v3067_v2  ;;  %v258_v1 = vld [vmem:[#allocation5 + $0x5e0] sm:$0xff]  ;;  %v255_v2 = vld [vmem:[#allocation5 + $0x5c8] sm:$0xff] }
  0x75   :  { %v3129_v6 = vcombine.high %v254_v0, %v258_v1  ;;  %v3128_v13 = vcombine.low %v254_v0, %v258_v1  ;;  %v3130_v14 = vcombine.low %v255_v2, %v259_v3 }
  0x77   :  { %2447 = vmatpush1.bf16.msra.mxu0 %v3064_v8  ;;  %2570 = vmatpush1.bf16.msra.mxu1 %v3066_v9  ;;  %v3131_v8 = vcombine.high %v255_v2, %v259_v3  ;;  %v262_v9 = vld [vmem:[#allocation5 + $0x600] sm:$0xff] }
  0x78   :  { %2457 = vmatprep.subr.bf16.mxu0 %v3073_v10  ;;  %2580 = vmatprep.subr.bf16.mxu1 %v3075_v11  ;;  %v266_v10 = vld [vmem:[#allocation5 + $0x620] sm:$0xff]  ;;  %v263_v11 = vld [vmem:[#allocation5 + $0x608] sm:$0xff] }
  0x79   :  { %v3137_v16 = vcombine.high %v262_v9, %v266_v10  ;;  %v3139_v17 = vcombine.high %v263_v11, %v267_v12  ;;  %v3136_v22 = vcombine.low %v262_v9, %v266_v10  ;;  %v3138_v23 = vcombine.low %v263_v11, %v267_v12 }
  0x7a   :  { %2449 = vmatmul.mubr.bf16.vlgmr.msra.gmra.mrb[0].mxu0 %v3547_v15  ;;  %2572 = vmatmul.mubr.bf16.vlgmr.msra.gmra.mrb[0].mxu1 %v3547_v15 }
  0x7b   :  { %2458 = vmatpush1.bf16.msra.mxu0 %v3072_v18  ;;  %2581 = vmatpush1.bf16.msra.mxu1 %v3074_v19  ;;  %v270_v18 = vld [vmem:[#allocation5 + $0x640] sm:$0xff] }
  0x7c   :  { %2459 = vmatprep.subr.bf16.mxu0 %v3081_v20  ;;  %2582 = vmatprep.subr.bf16.mxu1 %v3083_v21  ;;  %v274_v19 = vld [vmem:[#allocation5 + $0x660] sm:$0xff]  ;;  %v271_v20 = vld [vmem:[#allocation5 + $0x648] sm:$0xff] }
  0x7d   :  { %2489 = vmatprep.mubr.bf16.mxu0 %v3549_v24  ;;  %2612 = vmatprep.mubr.bf16.mxu1 %v3549_v24  ;;  %v275_v21 = vld [vmem:[#allocation5 + $0x668] sm:$0xff]  ;;  %v3145_v25 = vcombine.high %v270_v18, %v274_v19  ;;  %v3144_v30 = vcombine.low %v270_v18, %v274_v19  ;;  %v3555_v18 = vld [vmem:[#allocation2 + $0x10] sm:$0xff] }
  0x7e   :  { %v3147_v26 = vcombine.high %v271_v20, %v275_v21  ;;  %v3146_v31 = vcombine.low %v271_v20, %v275_v21 }
  0x7f   :  { %2460 = vmatpush1.bf16.msra.mxu0 %v3080_v53  ;;  %2583 = vmatpush1.bf16.msra.mxu1 %v3082_v27  ;;  %v278_v53 = vld [vmem:[#allocation5 + $0x680] sm:$0xff] }
  0x80   :  { %2461 = vmatprep.subr.bf16.mxu0 %v3089_v28  ;;  %2584 = vmatprep.subr.bf16.mxu1 %v3091_v29  ;;  %v282_v27 = vld [vmem:[#allocation5 + $0x6a0] sm:$0xff]  ;;  %v279_v28 = vld [vmem:[#allocation5 + $0x688] sm:$0xff] }
  0x81   :  { %v283_v29 = vld [vmem:[#allocation5 + $0x6a8] sm:$0xff]  ;;  %v3153_v32 = vcombine.high %v278_v53, %v282_v27  ;;  %v3152_v38 = vcombine.low %v278_v53, %v282_v27  ;;  %v3561_v53 = vpack.c.bf16 %v3541_v7, %v3541_v7 }
  0x82   :  { %v3155_v33 = vcombine.high %v279_v28, %v283_v29  ;;  %v3154_v39 = vcombine.low %v279_v28, %v283_v29  ;;  %v335_v27 = vld [vmem:[#allocation5 + $0x848] sm:$0xff] }
  0x83   :  { %2462 = vmatpush1.bf16.msra.mxu0 %v3088_v34  ;;  %2585 = vmatpush1.bf16.msra.mxu1 %v3090_v35  ;;  %v286_v34 = vld [vmem:[#allocation5 + $0x6c0] sm:$0xff]  ;;  %v339_v28 = vld [vmem:[#allocation5 + $0x868] sm:$0xff] }
  0x84   :  { %2463 = vmatprep.subr.bf16.mxu0 %v3097_v36  ;;  %2586 = vmatprep.subr.bf16.mxu1 %v3099_v37  ;;  %v290_v35 = vld [vmem:[#allocation5 + $0x6e0] sm:$0xff]  ;;  %v287_v36 = vld [vmem:[#allocation5 + $0x6c8] sm:$0xff] }
  0x85   :  { %v291_v37 = vld [vmem:[#allocation5 + $0x6e8] sm:$0xff]  ;;  %v3161_v40 = vcombine.high %v286_v34, %v290_v35  ;;  %v3160_v46 = vcombine.low %v286_v34, %v290_v35  ;;  %v346_v34 = vld [vmem:[#allocation5 + $0x8a0] sm:$0xff] }
  0x86   :  { %v3163_v41 = vcombine.high %v287_v36, %v291_v37  ;;  %v3162_v47 = vcombine.low %v287_v36, %v291_v37  ;;  %v343_v36 = vld [vmem:[#allocation5 + $0x888] sm:$0xff] }
  0x87   :  { %2464 = vmatpush1.bf16.msra.mxu0 %v3096_v42  ;;  %2587 = vmatpush1.bf16.msra.mxu1 %v3098_v43  ;;  %v294_v42 = vld [vmem:[#allocation5 + $0x700] sm:$0xff]  ;;  %v347_v37 = vld [vmem:[#allocation5 + $0x8a8] sm:$0xff] }
  0x88   :  { %2465 = vmatprep.subr.bf16.mxu0 %v3105_v44  ;;  %2588 = vmatprep.subr.bf16.mxu1 %v3107_v45  ;;  %v298_v43 = vld [vmem:[#allocation5 + $0x720] sm:$0xff]  ;;  %v295_v44 = vld [vmem:[#allocation5 + $0x708] sm:$0xff] }
  0x89   :  { %v299_v45 = vld [vmem:[#allocation5 + $0x728] sm:$0xff]  ;;  %v3169_v48 = vcombine.high %v294_v42, %v298_v43  ;;  %v3168_v55 = vcombine.low %v294_v42, %v298_v43  ;;  %v354_v42 = vld [vmem:[#allocation5 + $0x8e0] sm:$0xff] }
  0x8a   :  { %v3171_v49 = vcombine.high %v295_v44, %v299_v45  ;;  %v3170_v56 = vcombine.low %v295_v44, %v299_v45  ;;  %v351_v43 = vld [vmem:[#allocation5 + $0x8c8] sm:$0xff] }
  0x8b   :  { %2466 = vmatpush1.bf16.msra.mxu0 %v3104_v50  ;;  %2589 = vmatpush1.bf16.msra.mxu1 %v3106_v51  ;;  %v302_v50 = vld [vmem:[#allocation5 + $0x740] sm:$0xff]  ;;  %v355_v44 = vld [vmem:[#allocation5 + $0x8e8] sm:$0xff] }
  0x8c   :  { %2467 = vmatprep.subr.bf16.mxu0 %v3113_v52  ;;  %2590 = vmatprep.subr.bf16.mxu1 %v3115_v54  ;;  %v306_v51 = vld [vmem:[#allocation5 + $0x760] sm:$0xff]  ;;  %v303_v52 = vld [vmem:[#allocation5 + $0x748] sm:$0xff] }
  0x8d   :  { %v307_v54 = vld [vmem:[#allocation5 + $0x768] sm:$0xff]  ;;  %v3177_v57 = vcombine.high %v302_v50, %v306_v51  ;;  %v3176_v0 = vcombine.low %v302_v50, %v306_v51  ;;  %v362_v50 = vld [vmem:[#allocation5 + $0x920] sm:$0xff] }
  0x8e   :  { %v3179_v58 = vcombine.high %v303_v52, %v307_v54  ;;  %v3178_v1 = vcombine.low %v303_v52, %v307_v54  ;;  %v359_v51 = vld [vmem:[#allocation5 + $0x908] sm:$0xff] }
  0x8f   :  { %2468 = vmatpush1.bf16.msra.mxu0 %v3112_v59  ;;  %2591 = vmatpush1.bf16.msra.mxu1 %v3114_v60  ;;  %v310_v59 = vld [vmem:[#allocation5 + $0x780] sm:$0xff]  ;;  %v363_v52 = vld [vmem:[#allocation5 + $0x928] sm:$0xff] }
  0x90   :  { %2469 = vmatprep.subr.bf16.mxu0 %v3121_v62  ;;  %2592 = vmatprep.subr.bf16.mxu1 %v3123_v63  ;;  %v314_v60 = vld [vmem:[#allocation5 + $0x7a0] sm:$0xff]  ;;  %v311_v62 = vld [vmem:[#allocation5 + $0x788] sm:$0xff] }
  0x91   :  { %v315_v63 = vld [vmem:[#allocation5 + $0x7a8] sm:$0xff]  ;;  %v3185_v2 = vcombine.high %v310_v59, %v314_v60  ;;  %v3184_v9 = vcombine.low %v310_v59, %v314_v60  ;;  %v370_v59 = vld [vmem:[#allocation5 + $0x960] sm:$0xff] }
  0x92   :  { %v3187_v3 = vcombine.high %v311_v62, %v315_v63  ;;  %v3186_v10 = vcombine.low %v311_v62, %v315_v63  ;;  %v367_v60 = vld [vmem:[#allocation5 + $0x948] sm:$0xff] }
  0x93   :  { %2470 = vmatpush1.bf16.msra.mxu0 %v3120_v4  ;;  %2593 = vmatpush1.bf16.msra.mxu1 %v3122_v5  ;;  %v318_v4 = vld [vmem:[#allocation5 + $0x7c0] sm:$0xff]  ;;  %v371_v62 = vld [vmem:[#allocation5 + $0x968] sm:$0xff] }
  0x94   :  { %2471 = vmatprep.subr.bf16.mxu0 %v3129_v6  ;;  %2594 = vmatprep.subr.bf16.mxu1 %v3131_v8  ;;  %v322_v5 = vld [vmem:[#allocation5 + $0x7e0] sm:$0xff]  ;;  %v319_v6 = vld [vmem:[#allocation5 + $0x7c8] sm:$0xff] }
  0x95   :  { %v323_v8 = vld [vmem:[#allocation5 + $0x7e8] sm:$0xff]  ;;  %v3193_v11 = vcombine.high %v318_v4, %v322_v5  ;;  %v3192_v19 = vcombine.low %v318_v4, %v322_v5  ;;  %v378_v4 = vld [vmem:[#allocation5 + $0x9a0] sm:$0xff] }
  0x96   :  { %v3195_v12 = vcombine.high %v319_v6, %v323_v8  ;;  %v3194_v20 = vcombine.low %v319_v6, %v323_v8  ;;  %v375_v5 = vld [vmem:[#allocation5 + $0x988] sm:$0xff] }
  0x97   :  { %2472 = vmatpush1.bf16.msra.mxu0 %v3128_v13  ;;  %2595 = vmatpush1.bf16.msra.mxu1 %v3130_v14  ;;  %v326_v13 = vld [vmem:[#allocation5 + $0x800] sm:$0xff]  ;;  %v379_v6 = vld [vmem:[#allocation5 + $0x9a8] sm:$0xff] }
  0x98   :  { %2473 = vmatprep.subr.bf16.mxu0 %v3137_v16  ;;  %2596 = vmatprep.subr.bf16.mxu1 %v3139_v17  ;;  %v330_v14 = vld [vmem:[#allocation5 + $0x820] sm:$0xff]  ;;  %v327_v16 = vld [vmem:[#allocation5 + $0x808] sm:$0xff] }
  0x99   :  { %v331_v17 = vld [vmem:[#allocation5 + $0x828] sm:$0xff]  ;;  %v3201_v21 = vcombine.high %v326_v13, %v330_v14  ;;  %v3200_v29 = vcombine.low %v326_v13, %v330_v14  ;;  %v386_v13 = vld [vmem:[#allocation5 + $0x9e0] sm:$0xff] }
  0x9a   :  { %v383_v14 = vld [vmem:[#allocation5 + $0x9c8] sm:$0xff] }
  0x9b   :  { %2474 = vmatpush1.bf16.msra.mxu0 %v3136_v22  ;;  %2597 = vmatpush1.bf16.msra.mxu1 %v3138_v23  ;;  %v3203_v22 = vcombine.high %v327_v16, %v331_v17  ;;  %v334_v23 = vld [vmem:[#allocation5 + $0x840] sm:$0xff] }
  0x9c   :  { %2475 = vmatprep.subr.bf16.mxu0 %v3145_v25  ;;  %2598 = vmatprep.subr.bf16.mxu1 %v3147_v26  ;;  %v338_v25 = vld [vmem:[#allocation5 + $0x860] sm:$0xff]  ;;  %v60_v26 = vcombine.high %v3555_v18, %v3555_v18 }
  0x9d   :  { %v3208_v7 = vcombine.low %v334_v23, %v338_v25 }
  0x9e   :  { %v3563_v35 = vpack.c.bf16 %v60_v26, %v60_v26  ;;  %v395_v26 = vld [vmem:[#allocation5 + $0xa28] sm:$0xff] }
  0x9f   :  { %2476 = vmatpush1.bf16.msra.mxu0 %v3144_v30  ;;  %2599 = vmatpush1.bf16.msra.mxu1 %v3146_v31  ;;  %v3202_v30 = vcombine.low %v327_v16, %v331_v17  ;;  %v3209_v31 = vcombine.high %v334_v23, %v338_v25  ;;  %v387_v16 = vld [vmem:[#allocation5 + $0x9e8] sm:$0xff]  ;;  %v394_v23 = vld [vmem:[#allocation5 + $0xa20] sm:$0xff] }
  0xa0   :  { %2477 = vmatprep.subr.bf16.mxu0 %v3153_v32  ;;  %2600 = vmatprep.subr.bf16.mxu1 %v3155_v33  ;;  %v3211_v32 = vcombine.high %v335_v27, %v339_v28  ;;  %v342_v33 = vld [vmem:[#allocation5 + $0x880] sm:$0xff]  ;;  %v391_v25 = vld [vmem:[#allocation5 + $0xa08] sm:$0xff] }
  0xa1   :  { %v3216_v45 = vcombine.low %v342_v33, %v346_v34 }
  0xa3   :  { %2478 = vmatpush1.bf16.msra.mxu0 %v3152_v38  ;;  %2601 = vmatpush1.bf16.msra.mxu1 %v3154_v39  ;;  %v3210_v38 = vcombine.low %v335_v27, %v339_v28  ;;  %v3217_v39 = vcombine.high %v342_v33, %v346_v34  ;;  %v3258_v28 = vcombine.low %v383_v14, %v387_v16  ;;  %v399_v33 = vld [vmem:[#allocation5 + $0xa48] sm:$0xff] }
  0xa4   :  { %2479 = vmatprep.subr.bf16.mxu0 %v3161_v40  ;;  %2602 = vmatprep.subr.bf16.mxu1 %v3163_v41  ;;  %v3219_v40 = vcombine.high %v343_v36, %v347_v37  ;;  %v350_v41 = vld [vmem:[#allocation5 + $0x8c0] sm:$0xff]  ;;  %v403_v34 = vld [vmem:[#allocation5 + $0xa68] sm:$0xff] }
  0xa5   :  { %v3224_v54 = vcombine.low %v350_v41, %v354_v42 }
  0xa7   :  { %2480 = vmatpush1.bf16.msra.mxu0 %v3160_v46  ;;  %2603 = vmatpush1.bf16.msra.mxu1 %v3162_v47  ;;  %v3218_v46 = vcombine.low %v343_v36, %v347_v37  ;;  %v3225_v47 = vcombine.high %v350_v41, %v354_v42  ;;  %v3266_v37 = vcombine.low %v391_v25, %v395_v26  ;;  %v407_v41 = vld [vmem:[#allocation5 + $0xa88] sm:$0xff] }
  0xa8   :  { %2481 = vmatprep.subr.bf16.mxu0 %v3169_v48  ;;  %2604 = vmatprep.subr.bf16.mxu1 %v3171_v49  ;;  %v3227_v48 = vcombine.high %v351_v43, %v355_v44  ;;  %v358_v49 = vld [vmem:[#allocation5 + $0x900] sm:$0xff]  ;;  %v411_v42 = vld [vmem:[#allocation5 + $0xaa8] sm:$0xff] }
  0xa9   :  { %v3232_v63 = vcombine.low %v358_v49, %v362_v50 }
  0xab   :  { %2482 = vmatpush1.bf16.msra.mxu0 %v3168_v55  ;;  %2605 = vmatpush1.bf16.msra.mxu1 %v3170_v56  ;;  %v3226_v55 = vcombine.low %v351_v43, %v355_v44  ;;  %v3233_v56 = vcombine.high %v358_v49, %v362_v50  ;;  %v3274_v44 = vcombine.low %v399_v33, %v403_v34  ;;  %v415_v49 = vld [vmem:[#allocation5 + $0xac8] sm:$0xff] }
  0xac   :  { %2483 = vmatprep.subr.bf16.mxu0 %v3177_v57  ;;  %2606 = vmatprep.subr.bf16.mxu1 %v3179_v58  ;;  %v3235_v57 = vcombine.high %v359_v51, %v363_v52  ;;  %v366_v58 = vld [vmem:[#allocation5 + $0x940] sm:$0xff]  ;;  %v419_v50 = vld [vmem:[#allocation5 + $0xae8] sm:$0xff] }
  0xad   :  { %v3240_v8 = vcombine.low %v366_v58, %v370_v59 }
  0xaf   :  { %2484 = vmatpush1.bf16.msra.mxu0 %v3176_v0  ;;  %2607 = vmatpush1.bf16.msra.mxu1 %v3178_v1  ;;  %v3234_v0 = vcombine.low %v359_v51, %v363_v52  ;;  %v3241_v1 = vcombine.high %v366_v58, %v370_v59  ;;  %v3282_v52 = vcombine.low %v407_v41, %v411_v42  ;;  %v423_v58 = vld [vmem:[#allocation5 + $0xb08] sm:$0xff] }
  0xb0   :  { %2485 = vmatprep.subr.bf16.mxu0 %v3185_v2  ;;  %2608 = vmatprep.subr.bf16.mxu1 %v3187_v3  ;;  %v3243_v2 = vcombine.high %v367_v60, %v371_v62  ;;  %v374_v3 = vld [vmem:[#allocation5 + $0x980] sm:$0xff]  ;;  %v427_v59 = vld [vmem:[#allocation5 + $0xb28] sm:$0xff] }
  0xb1   :  { %v3248_v17 = vcombine.low %v374_v3, %v378_v4 }
  0xb3   :  { %2486 = vmatpush1.bf16.msra.mxu0 %v3184_v9  ;;  %2609 = vmatpush1.bf16.msra.mxu1 %v3186_v10  ;;  %v3242_v9 = vcombine.low %v367_v60, %v371_v62  ;;  %v3249_v10 = vcombine.high %v374_v3, %v378_v4  ;;  %v3290_v62 = vcombine.low %v415_v49, %v419_v50  ;;  %v431_v3 = vld [vmem:[#allocation5 + $0xb48] sm:$0xff] }
  0xb4   :  { %2487 = vmatprep.subr.bf16.mxu0 %v3193_v11  ;;  %2610 = vmatprep.subr.bf16.mxu1 %v3195_v12  ;;  %v3251_v11 = vcombine.high %v375_v5, %v379_v6  ;;  %v382_v12 = vld [vmem:[#allocation5 + $0x9c0] sm:$0xff]  ;;  %v435_v4 = vld [vmem:[#allocation5 + $0xb68] sm:$0xff] }
  0xb5   :  { %v3256_v27 = vcombine.low %v382_v12, %v386_v13 }
  0xb7   :  { %2488 = vmatpush1.bf16.msra.mxu0 %v3192_v19  ;;  %2611 = vmatpush1.bf16.msra.mxu1 %v3194_v20  ;;  %v3250_v19 = vcombine.low %v375_v5, %v379_v6  ;;  %v3257_v20 = vcombine.high %v382_v12, %v386_v13  ;;  %v3298_v6 = vcombine.low %v423_v58, %v427_v59  ;;  %v439_v12 = vld [vmem:[#allocation5 + $0xb88] sm:$0xff] }
  0xb8   :  { %2498 = vmatprep.subr.bf16.mxu0 %v3201_v21  ;;  %2621 = vmatprep.subr.bf16.mxu1 %v3203_v22  ;;  %v3259_v21 = vcombine.high %v383_v14, %v387_v16  ;;  %v390_v22 = vld [vmem:[#allocation5 + $0xa00] sm:$0xff]  ;;  %v443_v13 = vld [vmem:[#allocation5 + $0xba8] sm:$0xff]  ;;  %v3306_v16 = vcombine.low %v431_v3, %v435_v4 }
  0xb9   :  { %v3264_v36 = vcombine.low %v390_v22, %v394_v23 }
  0xba   :  { %2490 = vmatmul.mubr.bf16.vlgmr.msra.gmra.mrb[0].mxu0 %v3561_v53  ;;  %2613 = vmatmul.mubr.bf16.vlgmr.msra.gmra.mrb[0].mxu1 %v3561_v53 }
  0xbb   :  { %2499 = vmatpush1.bf16.msra.mxu0 %v3200_v29  ;;  %2622 = vmatpush1.bf16.msra.mxu1 %v3202_v30  ;;  %v3265_v29 = vcombine.high %v390_v22, %v394_v23  ;;  %v3267_v30 = vcombine.high %v391_v25, %v395_v26  ;;  %v447_v22 = vld [vmem:[#allocation5 + $0xbc8] sm:$0xff]  ;;  %v3314_v26 = vcombine.low %v439_v12, %v443_v13 }
  0xbc   :  { %2500 = vmatprep.subr.bf16.mxu0 %v3209_v31  ;;  %2623 = vmatprep.subr.bf16.mxu1 %v3211_v32  ;;  %v398_v31 = vld [vmem:[#allocation5 + $0xa40] sm:$0xff]  ;;  %v451_v23 = vld [vmem:[#allocation5 + $0xbe8] sm:$0xff] }
  0xbd   :  { %2530 = vmatprep.mubr.bf16.mxu0 %v3563_v35  ;;  %2653 = vmatprep.mubr.bf16.mxu1 %v3563_v35  ;;  %v402_v32 = vld [vmem:[#allocation5 + $0xa60] sm:$0xff] }
  0xbe   :  { %v3272_v43 = vcombine.low %v398_v31, %v402_v32 }
  0xbf   :  { %2501 = vmatpush1.bf16.msra.mxu0 %v3208_v7  ;;  %2624 = vmatpush1.bf16.msra.mxu1 %v3210_v38  ;;  %v3273_v7 = vcombine.high %v398_v31, %v402_v32  ;;  %v3275_v38 = vcombine.high %v399_v33, %v403_v34  ;;  %v73_v31 = vld [vmem:[#allocation5 + $0x18] sm:$0xff]  ;;  %v3322_v34 = vcombine.low %v447_v22, %v451_v23 }
  0xc0   :  { %2502 = vmatprep.subr.bf16.mxu0 %v3217_v39  ;;  %2625 = vmatprep.subr.bf16.mxu1 %v3219_v40  ;;  %v406_v39 = vld [vmem:[#allocation5 + $0xa80] sm:$0xff]  ;;  %v77_v32 = vld [vmem:[#allocation5 + $0x38] sm:$0xff] }
  0xc1   :  { %v410_v40 = vld [vmem:[#allocation5 + $0xaa0] sm:$0xff] }
  0xc2   :  { %v3280_v51 = vcombine.low %v406_v39, %v410_v40 }
  0xc3   :  { %2503 = vmatpush1.bf16.msra.mxu0 %v3216_v45  ;;  %2626 = vmatpush1.bf16.msra.mxu1 %v3218_v46  ;;  %v3281_v45 = vcombine.high %v406_v39, %v410_v40  ;;  %v3283_v46 = vcombine.high %v407_v41, %v411_v42  ;;  %v3571_v39 = vpack.c.bf16 %v3555_v18, %v3555_v18  ;;  %v81_v40 = vld [vmem:[#allocation5 + $0x58] sm:$0xff] }
  0xc4   :  { %2504 = vmatprep.subr.bf16.mxu0 %v3225_v47  ;;  %2627 = vmatprep.subr.bf16.mxu1 %v3227_v48  ;;  %v414_v47 = vld [vmem:[#allocation5 + $0xac0] sm:$0xff]  ;;  %v85_v41 = vld [vmem:[#allocation5 + $0x78] sm:$0xff] }
  0xc5   :  { %v418_v48 = vld [vmem:[#allocation5 + $0xae0] sm:$0xff] }
  0xc6   :  { %v3288_v60 = vcombine.low %v414_v47, %v418_v48 }
  0xc7   :  { %2505 = vmatpush1.bf16.msra.mxu0 %v3224_v54  ;;  %2628 = vmatpush1.bf16.msra.mxu1 %v3226_v55  ;;  %v3289_v54 = vcombine.high %v414_v47, %v418_v48  ;;  %v3291_v55 = vcombine.high %v415_v49, %v419_v50  ;;  %v92_v47 = vld [vmem:[#allocation5 + $0xb0] sm:$0xff]  ;;  %v89_v48 = vld [vmem:[#allocation5 + $0x98] sm:$0xff]  ;;  %v2958_v50 = vcombine.low %v81_v40, %v85_v41 }
  0xc8   :  { %2506 = vmatprep.subr.bf16.mxu0 %v3233_v56  ;;  %2629 = vmatprep.subr.bf16.mxu1 %v3235_v57  ;;  %v422_v56 = vld [vmem:[#allocation5 + $0xb00] sm:$0xff]  ;;  %v93_v49 = vld [vmem:[#allocation5 + $0xb8] sm:$0xff] }
  0xc9   :  { %v426_v57 = vld [vmem:[#allocation5 + $0xb20] sm:$0xff] }
  0xca   :  { %v3296_v5 = vcombine.low %v422_v56, %v426_v57 }
  0xcb   :  { %2507 = vmatpush1.bf16.msra.mxu0 %v3232_v63  ;;  %2630 = vmatpush1.bf16.msra.mxu1 %v3234_v0  ;;  %v3297_v63 = vcombine.high %v422_v56, %v426_v57  ;;  %v3299_v0 = vcombine.high %v423_v58, %v427_v59  ;;  %v97_v56 = vld [vmem:[#allocation5 + $0xd8] sm:$0xff]  ;;  %v2966_v59 = vcombine.low %v89_v48, %v93_v49 }
  0xcc   :  { %2508 = vmatprep.subr.bf16.mxu0 %v3241_v1  ;;  %2631 = vmatprep.subr.bf16.mxu1 %v3243_v2  ;;  %v430_v1 = vld [vmem:[#allocation5 + $0xb40] sm:$0xff]  ;;  %v101_v57 = vld [vmem:[#allocation5 + $0xf8] sm:$0xff] }
  0xcd   :  { %v434_v2 = vld [vmem:[#allocation5 + $0xb60] sm:$0xff] }
  0xce   :  { %v3304_v14 = vcombine.low %v430_v1, %v434_v2 }
  0xcf   :  { %2509 = vmatpush1.bf16.msra.mxu0 %v3240_v8  ;;  %2632 = vmatpush1.bf16.msra.mxu1 %v3242_v9  ;;  %v3305_v8 = vcombine.high %v430_v1, %v434_v2  ;;  %v3307_v9 = vcombine.high %v431_v3, %v435_v4  ;;  %v105_v1 = vld [vmem:[#allocation5 + $0x118] sm:$0xff]  ;;  %v2974_v4 = vcombine.low %v97_v56, %v101_v57 }
  0xd0   :  { %2510 = vmatprep.subr.bf16.mxu0 %v3249_v10  ;;  %2633 = vmatprep.subr.bf16.mxu1 %v3251_v11  ;;  %v438_v10 = vld [vmem:[#allocation5 + $0xb80] sm:$0xff]  ;;  %v109_v2 = vld [vmem:[#allocation5 + $0x138] sm:$0xff] }
  0xd1   :  { %v442_v11 = vld [vmem:[#allocation5 + $0xba0] sm:$0xff] }
  0xd2   :  { %v3312_v25 = vcombine.low %v438_v10, %v442_v11 }
  0xd3   :  { %2511 = vmatpush1.bf16.msra.mxu0 %v3248_v17  ;;  %2634 = vmatpush1.bf16.msra.mxu1 %v3250_v19  ;;  %v3313_v17 = vcombine.high %v438_v10, %v442_v11  ;;  %v3315_v19 = vcombine.high %v439_v12, %v443_v13  ;;  %v117_v10 = vld [vmem:[#allocation5 + $0x178] sm:$0xff]  ;;  %v2982_v12 = vcombine.low %v105_v1, %v109_v2 }
  0xd4   :  { %2512 = vmatprep.subr.bf16.mxu0 %v3257_v20  ;;  %2635 = vmatprep.subr.bf16.mxu1 %v3259_v21  ;;  %v446_v20 = vld [vmem:[#allocation5 + $0xbc0] sm:$0xff] }
  0xd5   :  { %v450_v21 = vld [vmem:[#allocation5 + $0xbe0] sm:$0xff] }
  0xd6   :  { %v3320_v33 = vcombine.low %v446_v20, %v450_v21 }
  0xd7   :  { %2513 = vmatpush1.bf16.msra.mxu0 %v3256_v27  ;;  %2636 = vmatpush1.bf16.msra.mxu1 %v3258_v28  ;;  %v3321_v27 = vcombine.high %v446_v20, %v450_v21  ;;  %v3323_v28 = vcombine.high %v447_v22, %v451_v23  ;;  %v125_v20 = vld [vmem:[#allocation5 + $0x1b8] sm:$0xff] }
  0xd8   :  { %2514 = vmatprep.subr.bf16.mxu0 %v3265_v29  ;;  %2637 = vmatprep.subr.bf16.mxu1 %v3267_v30  ;;  %v72_v29 = vld [vmem:[#allocation5 + $0x10] sm:$0xff] }
  0xd9   :  { %v76_v30 = vld [vmem:[#allocation5 + $0x30] sm:$0xff] }
  0xda   :  { %v2948_v42 = vcombine.low %v72_v29, %v76_v30 }
  0xdb   :  { %2515 = vmatpush1.bf16.msra.mxu0 %v3264_v36  ;;  %2638 = vmatpush1.bf16.msra.mxu1 %v3266_v37  ;;  %v2949_v36 = vcombine.high %v72_v29, %v76_v30  ;;  %v2951_v37 = vcombine.high %v73_v31, %v77_v32  ;;  %v133_v29 = vld [vmem:[#allocation5 + $0x1f8] sm:$0xff] }
  0xdc   :  { %2516 = vmatprep.subr.bf16.mxu0 %v3273_v7  ;;  %2639 = vmatprep.subr.bf16.mxu1 %v3275_v38  ;;  %v80_v7 = vld [vmem:[#allocation5 + $0x50] sm:$0xff] }
  0xdd   :  { %v84_v38 = vld [vmem:[#allocation5 + $0x70] sm:$0xff] }
  0xde   :  { %v2956_v18 = vcombine.low %v80_v7, %v84_v38 }
  0xdf   :  { %2517 = vmatpush1.bf16.msra.mxu0 %v3272_v43  ;;  %2640 = vmatpush1.bf16.msra.mxu1 %v3274_v44  ;;  %v2950_v43 = vcombine.low %v73_v31, %v77_v32  ;;  %v2957_v44 = vcombine.high %v80_v7, %v84_v38  ;;  %v141_v7 = vld [vmem:[#allocation5 + $0x238] sm:$0xff] }
  0xe0   :  { %2518 = vmatprep.subr.bf16.mxu0 %v3281_v45  ;;  %2641 = vmatprep.subr.bf16.mxu1 %v3283_v46  ;;  %v2959_v45 = vcombine.high %v81_v40, %v85_v41  ;;  %v88_v46 = vld [vmem:[#allocation5 + $0x90] sm:$0xff] }
  0xe1   :  { %v2964_v58 = vcombine.low %v88_v46, %v92_v47 }
  0xe3   :  { %2519 = vmatpush1.bf16.msra.mxu0 %v3280_v51  ;;  %2642 = vmatpush1.bf16.msra.mxu1 %v3282_v52  ;;  %v2965_v51 = vcombine.high %v88_v46, %v92_v47  ;;  %v2967_v52 = vcombine.high %v89_v48, %v93_v49  ;;  %v149_v46 = vld [vmem:[#allocation5 + $0x278] sm:$0xff] }
  0xe4   :  { %2520 = vmatprep.subr.bf16.mxu0 %v3289_v54  ;;  %2643 = vmatprep.subr.bf16.mxu1 %v3291_v55  ;;  %v96_v54 = vld [vmem:[#allocation5 + $0xd0] sm:$0xff] }
  0xe5   :  { %v100_v55 = vld [vmem:[#allocation5 + $0xf0] sm:$0xff] }
  0xe6   :  { %v2972_v3 = vcombine.low %v96_v54, %v100_v55 }
  0xe7   :  { %2521 = vmatpush1.bf16.msra.mxu0 %v3288_v60  ;;  %2644 = vmatpush1.bf16.msra.mxu1 %v3290_v62  ;;  %v2973_v60 = vcombine.high %v96_v54, %v100_v55  ;;  %v2975_v62 = vcombine.high %v97_v56, %v101_v57  ;;  %v157_v54 = vld [vmem:[#allocation5 + $0x2b8] sm:$0xff] }
  0xe8   :  { %2522 = vmatprep.subr.bf16.mxu0 %v3297_v63  ;;  %2645 = vmatprep.subr.bf16.mxu1 %v3299_v0  ;;  %v104_v63 = vld [vmem:[#allocation5 + $0x110] sm:$0xff] }
  0xe9   :  { %v108_v0 = vld [vmem:[#allocation5 + $0x130] sm:$0xff] }
  0xea   :  { %v2980_v11 = vcombine.low %v104_v63, %v108_v0 }
  0xeb   :  { %2523 = vmatpush1.bf16.msra.mxu0 %v3296_v5  ;;  %2646 = vmatpush1.bf16.msra.mxu1 %v3298_v6  ;;  %v2981_v5 = vcombine.high %v104_v63, %v108_v0  ;;  %v112_v6 = vld [vmem:[#allocation5 + $0x150] sm:$0xff]  ;;  %v165_v63 = vld [vmem:[#allocation5 + $0x2f8] sm:$0xff] }
  0xec   :  { %2524 = vmatprep.subr.bf16.mxu0 %v3305_v8  ;;  %2647 = vmatprep.subr.bf16.mxu1 %v3307_v9  ;;  %v116_v8 = vld [vmem:[#allocation5 + $0x170] sm:$0xff]  ;;  %v113_v9 = vld [vmem:[#allocation5 + $0x158] sm:$0xff] }
  0xed   :  { %v2989_v13 = vcombine.high %v112_v6, %v116_v8  ;;  %v2988_v21 = vcombine.low %v112_v6, %v116_v8  ;;  %v2990_v22 = vcombine.low %v113_v9, %v117_v10  ;;  %v173_v6 = vld [vmem:[#allocation5 + $0x338] sm:$0xff] }
  0xef   :  { %2525 = vmatpush1.bf16.msra.mxu0 %v3304_v14  ;;  %2648 = vmatpush1.bf16.msra.mxu1 %v3306_v16  ;;  %v2991_v14 = vcombine.high %v113_v9, %v117_v10  ;;  %v120_v16 = vld [vmem:[#allocation5 + $0x190] sm:$0xff] }
  0xf0   :  { %2526 = vmatprep.subr.bf16.mxu0 %v3313_v17  ;;  %2649 = vmatprep.subr.bf16.mxu1 %v3315_v19  ;;  %v124_v17 = vld [vmem:[#allocation5 + $0x1b0] sm:$0xff]  ;;  %v121_v19 = vld [vmem:[#allocation5 + $0x198] sm:$0xff] }
  0xf1   :  { %v2997_v23 = vcombine.high %v120_v16, %v124_v17  ;;  %v2996_v30 = vcombine.low %v120_v16, %v124_v17  ;;  %v2998_v31 = vcombine.low %v121_v19, %v125_v20  ;;  %v181_v16 = vld [vmem:[#allocation5 + $0x378] sm:$0xff] }
  0xf3   :  { %2527 = vmatpush1.bf16.msra.mxu0 %v3312_v25  ;;  %2650 = vmatpush1.bf16.msra.mxu1 %v3314_v26  ;;  %v2999_v25 = vcombine.high %v121_v19, %v125_v20  ;;  %v128_v26 = vld [vmem:[#allocation5 + $0x1d0] sm:$0xff] }
  0xf4   :  { %2528 = vmatprep.subr.bf16.mxu0 %v3321_v27  ;;  %2651 = vmatprep.subr.bf16.mxu1 %v3323_v28  ;;  %v132_v27 = vld [vmem:[#allocation5 + $0x1f0] sm:$0xff]  ;;  %v129_v28 = vld [vmem:[#allocation5 + $0x1d8] sm:$0xff] }
  0xf5   :  { %v3005_v32 = vcombine.high %v128_v26, %v132_v27  ;;  %v3004_v38 = vcombine.low %v128_v26, %v132_v27  ;;  %v3006_v40 = vcombine.low %v129_v28, %v133_v29  ;;  %v189_v26 = vld [vmem:[#allocation5 + $0x3b8] sm:$0xff] }
  0xf7   :  { %2529 = vmatpush1.bf16.msra.mxu0 %v3320_v33  ;;  %2652 = vmatpush1.bf16.msra.mxu1 %v3322_v34  ;;  %v3007_v33 = vcombine.high %v129_v28, %v133_v29  ;;  %v136_v34 = vld [vmem:[#allocation5 + $0x210] sm:$0xff] }
  0xf8   :  { %2662 = vmatprep.subr.bf16.mxu0 %v2949_v36  ;;  %2785 = vmatprep.subr.bf16.mxu1 %v2951_v37  ;;  %v140_v36 = vld [vmem:[#allocation5 + $0x230] sm:$0xff]  ;;  %v137_v37 = vld [vmem:[#allocation5 + $0x218] sm:$0xff] }
  0xf9   :  { %v3013_v41 = vcombine.high %v136_v34, %v140_v36  ;;  %v3012_v47 = vcombine.low %v136_v34, %v140_v36  ;;  %v3014_v48 = vcombine.low %v137_v37, %v141_v7  ;;  %v197_v34 = vld [vmem:[#allocation5 + $0x3f8] sm:$0xff] }
  0xfa   :  { %2531 = vmatmul.mubr.bf16.vlgmr.msra.gmra.mrb[0].mxu0 %v3571_v39  ;;  %2654 = vmatmul.mubr.bf16.vlgmr.msra.gmra.mrb[0].mxu1 %v3571_v39 }
  0xfb   :  { %2663 = vmatpush1.bf16.msra.mxu0 %v2948_v42  ;;  %2786 = vmatpush1.bf16.msra.mxu1 %v2950_v43  ;;  %v3015_v42 = vcombine.high %v137_v37, %v141_v7  ;;  %v144_v43 = vld [vmem:[#allocation5 + $0x250] sm:$0xff] }
  0xfc   :  { %2664 = vmatprep.subr.bf16.mxu0 %v2957_v44  ;;  %2787 = vmatprep.subr.bf16.mxu1 %v2959_v45  ;;  %v148_v44 = vld [vmem:[#allocation5 + $0x270] sm:$0xff]  ;;  %v145_v45 = vld [vmem:[#allocation5 + $0x258] sm:$0xff] }
  0xfd   :  { %2694 = vmatprep.mubr.bf16.mxu0 %v3537_v61  ;;  %2817 = vmatprep.mubr.bf16.mxu1 %v3537_v61  ;;  %v2983_v61 = vcombine.high %v105_v1, %v109_v2  ;;  %v3021_v49 = vcombine.high %v144_v43, %v148_v44  ;;  %v3020_v55 = vcombine.low %v144_v43, %v148_v44  ;;  %v205_v43 = vld [vmem:[#allocation5 + $0x438] sm:$0xff] }
  0xfe   :  { %v3022_v56 = vcombine.low %v145_v45, %v149_v46 }
  0xff   :  { %2665 = vmatpush1.bf16.msra.mxu0 %v2956_v18  ;;  %2788 = vmatpush1.bf16.msra.mxu1 %v2958_v50  ;;  %v3023_v18 = vcombine.high %v145_v45, %v149_v46  ;;  %v152_v50 = vld [vmem:[#allocation5 + $0x290] sm:$0xff] }
 0x100   :  { %2666 = vmatprep.subr.bf16.mxu0 %v2965_v51  ;;  %2789 = vmatprep.subr.bf16.mxu1 %v2967_v52  ;;  %v156_v51 = vld [vmem:[#allocation5 + $0x2b0] sm:$0xff]  ;;  %v153_v52 = vld [vmem:[#allocation5 + $0x298] sm:$0xff] }
 0x101   :  { %v3029_v57 = vcombine.high %v152_v50, %v156_v51  ;;  %v3028_v0 = vcombine.low %v152_v50, %v156_v51  ;;  %v3030_v1 = vcombine.low %v153_v52, %v157_v54  ;;  %v213_v50 = vld [vmem:[#allocation5 + $0x478] sm:$0xff] }
 0x103   :  { %2667 = vmatpush1.bf16.msra.mxu0 %v2964_v58  ;;  %2790 = vmatpush1.bf16.msra.mxu1 %v2966_v59  ;;  %v3031_v58 = vcombine.high %v153_v52, %v157_v54  ;;  %v160_v59 = vld [vmem:[#allocation5 + $0x2d0] sm:$0xff] }
 0x104   :  { %2668 = vmatprep.subr.bf16.mxu0 %v2973_v60  ;;  %2791 = vmatprep.subr.bf16.mxu1 %v2975_v62  ;;  %v164_v60 = vld [vmem:[#allocation5 + $0x2f0] sm:$0xff]  ;;  %v161_v62 = vld [vmem:[#allocation5 + $0x2d8] sm:$0xff] }
 0x105   :  { %v3037_v2 = vcombine.high %v160_v59, %v164_v60  ;;  %v3036_v8 = vcombine.low %v160_v59, %v164_v60  ;;  %v3038_v9 = vcombine.low %v161_v62, %v165_v63  ;;  %v221_v59 = vld [vmem:[#allocation5 + $0x4b8] sm:$0xff] }
 0x107   :  { %2669 = vmatpush1.bf16.msra.mxu0 %v2972_v3  ;;  %2792 = vmatpush1.bf16.msra.mxu1 %v2974_v4  ;;  %v3039_v3 = vcombine.high %v161_v62, %v165_v63  ;;  %v168_v4 = vld [vmem:[#allocation5 + $0x310] sm:$0xff] }
 0x108   :  { %2670 = vmatprep.subr.bf16.mxu0 %v2981_v5  ;;  %2793 = vmatprep.subr.bf16.mxu1 %v2983_v61  ;;  %v172_v5 = vld [vmem:[#allocation5 + $0x330] sm:$0xff]  ;;  %v169_v61 = vld [vmem:[#allocation5 + $0x318] sm:$0xff] }
 0x109   :  { %v3045_v10 = vcombine.high %v168_v4, %v172_v5  ;;  %v3044_v17 = vcombine.low %v168_v4, %v172_v5  ;;  %v3046_v19 = vcombine.low %v169_v61, %v173_v6  ;;  %v229_v4 = vld [vmem:[#allocation5 + $0x4f8] sm:$0xff] }
 0x10b   :  { %2671 = vmatpush1.bf16.msra.mxu0 %v2980_v11  ;;  %2794 = vmatpush1.bf16.msra.mxu1 %v2982_v12  ;;  %v3047_v11 = vcombine.high %v169_v61, %v173_v6  ;;  %v176_v12 = vld [vmem:[#allocation5 + $0x350] sm:$0xff] }
 0x10c   :  { %2672 = vmatprep.subr.bf16.mxu0 %v2989_v13  ;;  %2795 = vmatprep.subr.bf16.mxu1 %v2991_v14  ;;  %v180_v13 = vld [vmem:[#allocation5 + $0x370] sm:$0xff]  ;;  %v177_v14 = vld [vmem:[#allocation5 + $0x358] sm:$0xff] }
 0x10d   :  { %v3053_v20 = vcombine.high %v176_v12, %v180_v13  ;;  %v3052_v27 = vcombine.low %v176_v12, %v180_v13  ;;  %v3054_v28 = vcombine.low %v177_v14, %v181_v16 }
 0x10f   :  { %2673 = vmatpush1.bf16.msra.mxu0 %v2988_v21  ;;  %2796 = vmatpush1.bf16.msra.mxu1 %v2990_v22  ;;  %v3055_v21 = vcombine.high %v177_v14, %v181_v16  ;;  %v184_v22 = vld [vmem:[#allocation5 + $0x390] sm:$0xff] }
 0x110   :  { %2674 = vmatprep.subr.bf16.mxu0 %v2997_v23  ;;  %2797 = vmatprep.subr.bf16.mxu1 %v2999_v25  ;;  %v188_v23 = vld [vmem:[#allocation5 + $0x3b0] sm:$0xff]  ;;  %v185_v25 = vld [vmem:[#allocation5 + $0x398] sm:$0xff] }
 0x111   :  { %v3061_v29 = vcombine.high %v184_v22, %v188_v23  ;;  %v3060_v36 = vcombine.low %v184_v22, %v188_v23  ;;  %v3062_v37 = vcombine.low %v185_v25, %v189_v26  ;;  %v240_v16 = vld [vmem:[#allocation5 + $0x550] sm:$0xff] }
 0x113   :  { %2675 = vmatpush1.bf16.msra.mxu0 %v2996_v30  ;;  %2798 = vmatpush1.bf16.msra.mxu1 %v2998_v31  ;;  %v3063_v30 = vcombine.high %v185_v25, %v189_v26  ;;  %v192_v31 = vld [vmem:[#allocation5 + $0x3d0] sm:$0xff] }
 0x114   :  { %2676 = vmatprep.subr.bf16.mxu0 %v3005_v32  ;;  %2799 = vmatprep.subr.bf16.mxu1 %v3007_v33  ;;  %v196_v32 = vld [vmem:[#allocation5 + $0x3f0] sm:$0xff]  ;;  %v193_v33 = vld [vmem:[#allocation5 + $0x3d8] sm:$0xff] }
 0x115   :  { %v3069_v7 = vcombine.high %v192_v31, %v196_v32  ;;  %v3068_v44 = vcombine.low %v192_v31, %v196_v32  ;;  %v3070_v45 = vcombine.low %v193_v33, %v197_v34  ;;  %v248_v26 = vld [vmem:[#allocation5 + $0x590] sm:$0xff] }
 0x117   :  { %2677 = vmatpush1.bf16.msra.mxu0 %v3004_v38  ;;  %2800 = vmatpush1.bf16.msra.mxu1 %v3006_v40  ;;  %v3071_v38 = vcombine.high %v193_v33, %v197_v34  ;;  %v200_v40 = vld [vmem:[#allocation5 + $0x410] sm:$0xff] }
 0x118   :  { %2678 = vmatprep.subr.bf16.mxu0 %v3013_v41  ;;  %2801 = vmatprep.subr.bf16.mxu1 %v3015_v42  ;;  %v204_v41 = vld [vmem:[#allocation5 + $0x430] sm:$0xff]  ;;  %v201_v42 = vld [vmem:[#allocation5 + $0x418] sm:$0xff] }
 0x119   :  { %v3077_v46 = vcombine.high %v200_v40, %v204_v41  ;;  %v3076_v51 = vcombine.low %v200_v40, %v204_v41  ;;  %v3078_v52 = vcombine.low %v201_v42, %v205_v43  ;;  %v256_v34 = vld [vmem:[#allocation5 + $0x5d0] sm:$0xff] }
 0x11b   :  { %2679 = vmatpush1.bf16.msra.mxu0 %v3012_v47  ;;  %2802 = vmatpush1.bf16.msra.mxu1 %v3014_v48  ;;  %v3079_v47 = vcombine.high %v201_v42, %v205_v43  ;;  %v208_v48 = vld [vmem:[#allocation5 + $0x450] sm:$0xff] }
 0x11c   :  { %2680 = vmatprep.subr.bf16.mxu0 %v3021_v49  ;;  %2803 = vmatprep.subr.bf16.mxu1 %v3023_v18  ;;  %v212_v49 = vld [vmem:[#allocation5 + $0x470] sm:$0xff]  ;;  %v209_v18 = vld [vmem:[#allocation5 + $0x458] sm:$0xff] }
 0x11d   :  { %v3085_v54 = vcombine.high %v208_v48, %v212_v49  ;;  %v3084_v60 = vcombine.low %v208_v48, %v212_v49  ;;  %v3086_v62 = vcombine.low %v209_v18, %v213_v50  ;;  %v264_v43 = vld [vmem:[#allocation5 + $0x610] sm:$0xff] }
 0x11f   :  { %2681 = vmatpush1.bf16.msra.mxu0 %v3020_v55  ;;  %2804 = vmatpush1.bf16.msra.mxu1 %v3022_v56  ;;  %v3087_v55 = vcombine.high %v209_v18, %v213_v50  ;;  %v216_v56 = vld [vmem:[#allocation5 + $0x490] sm:$0xff] }
 0x120   :  { %2682 = vmatprep.subr.bf16.mxu0 %v3029_v57  ;;  %2805 = vmatprep.subr.bf16.mxu1 %v3031_v58  ;;  %v220_v57 = vld [vmem:[#allocation5 + $0x4b0] sm:$0xff]  ;;  %v217_v58 = vld [vmem:[#allocation5 + $0x498] sm:$0xff] }
 0x121   :  { %v3093_v63 = vcombine.high %v216_v56, %v220_v57  ;;  %v3092_v5 = vcombine.low %v216_v56, %v220_v57  ;;  %v272_v50 = vld [vmem:[#allocation5 + $0x650] sm:$0xff] }
 0x123   :  { %2683 = vmatpush1.bf16.msra.mxu0 %v3028_v0  ;;  %2806 = vmatpush1.bf16.msra.mxu1 %v3030_v1  ;;  %v3095_v0 = vcombine.high %v217_v58, %v221_v59  ;;  %v224_v1 = vld [vmem:[#allocation5 + $0x4d0] sm:$0xff] }
 0x124   :  { %2684 = vmatprep.subr.bf16.mxu0 %v3037_v2  ;;  %2807 = vmatprep.subr.bf16.mxu1 %v3039_v3  ;;  %v228_v2 = vld [vmem:[#allocation5 + $0x4f0] sm:$0xff]  ;;  %v225_v3 = vld [vmem:[#allocation5 + $0x4d8] sm:$0xff] }
 0x125   :  { %v3101_v61 = vcombine.high %v224_v1, %v228_v2  ;;  %v3103_v6 = vcombine.high %v225_v3, %v229_v4  ;;  %v3100_v12 = vcombine.low %v224_v1, %v228_v2  ;;  %v3102_v13 = vcombine.low %v225_v3, %v229_v4  ;;  %v288_v4 = vld [vmem:[#allocation5 + $0x6d0] sm:$0xff] }
 0x127   :  { %2685 = vmatpush1.bf16.msra.mxu0 %v3036_v8  ;;  %2808 = vmatpush1.bf16.msra.mxu1 %v3038_v9  ;;  %v232_v8 = vld [vmem:[#allocation5 + $0x510] sm:$0xff] }
 0x128   :  { %2686 = vmatprep.subr.bf16.mxu0 %v3045_v10  ;;  %2809 = vmatprep.subr.bf16.mxu1 %v3047_v11  ;;  %v236_v9 = vld [vmem:[#allocation5 + $0x530] sm:$0xff]  ;;  %v233_v10 = vld [vmem:[#allocation5 + $0x518] sm:$0xff] }
 0x129   :  { %v237_v11 = vld [vmem:[#allocation5 + $0x538] sm:$0xff]  ;;  %v3109_v14 = vcombine.high %v232_v8, %v236_v9 }
 0x12a   :  { %v3110_v22 = vcombine.low %v233_v10, %v237_v11 }
 0x12b   :  { %2687 = vmatpush1.bf16.msra.mxu0 %v3044_v17  ;;  %2810 = vmatpush1.bf16.msra.mxu1 %v3046_v19  ;;  %v244_v17 = vld [vmem:[#allocation5 + $0x570] sm:$0xff]  ;;  %v241_v19 = vld [vmem:[#allocation5 + $0x558] sm:$0xff] }
 0x12c   :  { %2688 = vmatprep.subr.bf16.mxu0 %v3053_v20  ;;  %2811 = vmatprep.subr.bf16.mxu1 %v3055_v21  ;;  %v245_v20 = vld [vmem:[#allocation5 + $0x578] sm:$0xff]  ;;  %v3108_v21 = vcombine.low %v232_v8, %v236_v9  ;;  %v3117_v23 = vcombine.high %v240_v16, %v244_v17 }
 0x12d   :  { %v3119_v25 = vcombine.high %v241_v19, %v245_v20  ;;  %v3118_v31 = vcombine.low %v241_v19, %v245_v20  ;;  %v304_v20 = vld [vmem:[#allocation5 + $0x750] sm:$0xff] }
 0x12f   :  { %2689 = vmatpush1.bf16.msra.mxu0 %v3052_v27  ;;  %2812 = vmatpush1.bf16.msra.mxu1 %v3054_v28  ;;  %v252_v27 = vld [vmem:[#allocation5 + $0x5b0] sm:$0xff]  ;;  %v249_v28 = vld [vmem:[#allocation5 + $0x598] sm:$0xff] }
 0x130   :  { %2690 = vmatprep.subr.bf16.mxu0 %v3061_v29  ;;  %2813 = vmatprep.subr.bf16.mxu1 %v3063_v30  ;;  %v253_v29 = vld [vmem:[#allocation5 + $0x5b8] sm:$0xff]  ;;  %v3116_v30 = vcombine.low %v240_v16, %v244_v17  ;;  %v3125_v32 = vcombine.high %v248_v26, %v252_v27 }
 0x131   :  { %v3127_v33 = vcombine.high %v249_v28, %v253_v29  ;;  %v3126_v40 = vcombine.low %v249_v28, %v253_v29  ;;  %v312_v29 = vld [vmem:[#allocation5 + $0x790] sm:$0xff] }
 0x133   :  { %2691 = vmatpush1.bf16.msra.mxu0 %v3060_v36  ;;  %2814 = vmatpush1.bf16.msra.mxu1 %v3062_v37  ;;  %v260_v36 = vld [vmem:[#allocation5 + $0x5f0] sm:$0xff]  ;;  %v257_v37 = vld [vmem:[#allocation5 + $0x5d8] sm:$0xff] }
 0x134   :  { %2692 = vmatprep.subr.bf16.mxu0 %v3069_v7  ;;  %2815 = vmatprep.subr.bf16.mxu1 %v3071_v38  ;;  %v261_v7 = vld [vmem:[#allocation5 + $0x5f8] sm:$0xff]  ;;  %v3124_v38 = vcombine.low %v248_v26, %v252_v27  ;;  %v3133_v41 = vcombine.high %v256_v34, %v260_v36 }
 0x135   :  { %v3135_v42 = vcombine.high %v257_v37, %v261_v7  ;;  %v3134_v48 = vcombine.low %v257_v37, %v261_v7  ;;  %v320_v7 = vld [vmem:[#allocation5 + $0x7d0] sm:$0xff] }
 0x137   :  { %2693 = vmatpush1.bf16.msra.mxu0 %v3068_v44  ;;  %2816 = vmatpush1.bf16.msra.mxu1 %v3070_v45  ;;  %v268_v44 = vld [vmem:[#allocation5 + $0x630] sm:$0xff]  ;;  %v265_v45 = vld [vmem:[#allocation5 + $0x618] sm:$0xff] }
 0x138   :  { %2703 = vmatprep.subr.bf16.mxu0 %v3077_v46  ;;  %2826 = vmatprep.subr.bf16.mxu1 %v3079_v47  ;;  %v269_v46 = vld [vmem:[#allocation5 + $0x638] sm:$0xff]  ;;  %v3132_v47 = vcombine.low %v256_v34, %v260_v36  ;;  %v3141_v49 = vcombine.high %v264_v43, %v268_v44 }
 0x139   :  { %v3143_v18 = vcombine.high %v265_v45, %v269_v46  ;;  %v3142_v56 = vcombine.low %v265_v45, %v269_v46  ;;  %v328_v46 = vld [vmem:[#allocation5 + $0x810] sm:$0xff] }
 0x13a   :  { %2695 = vmatmul.mubr.bf16.vlgmr.msra.gmra.mrb[4].mxu0 %v3547_v15  ;;  %2818 = vmatmul.mubr.bf16.vlgmr.msra.gmra.mrb[4].mxu1 %v3547_v15  ;;  %v3094_v15 = vcombine.low %v217_v58, %v221_v59  ;;  %v280_v59 = vld [vmem:[#allocation5 + $0x690] sm:$0xff] }
 0x13b   :  { %2704 = vmatpush1.bf16.msra.mxu0 %v3076_v51  ;;  %2827 = vmatpush1.bf16.msra.mxu1 %v3078_v52  ;;  %v276_v51 = vld [vmem:[#allocation5 + $0x670] sm:$0xff]  ;;  %v273_v52 = vld [vmem:[#allocation5 + $0x658] sm:$0xff] }
 0x13c   :  { %2705 = vmatprep.subr.bf16.mxu0 %v3085_v54  ;;  %2828 = vmatprep.subr.bf16.mxu1 %v3087_v55  ;;  %v277_v54 = vld [vmem:[#allocation5 + $0x678] sm:$0xff]  ;;  %v3140_v55 = vcombine.low %v264_v43, %v268_v44  ;;  %v3149_v57 = vcombine.high %v272_v50, %v276_v51 }
 0x13d   :  { %2735 = vmatprep.mubr.bf16.mxu0 %v3549_v24  ;;  %2858 = vmatprep.mubr.bf16.mxu1 %v3549_v24  ;;  %v3111_v24 = vcombine.high %v233_v10, %v237_v11  ;;  %v3151_v58 = vcombine.high %v273_v52, %v277_v54  ;;  %v3150_v1 = vcombine.low %v273_v52, %v277_v54  ;;  %v296_v11 = vld [vmem:[#allocation5 + $0x710] sm:$0xff] }
 0x13e   :  { %v336_v54 = vld [vmem:[#allocation5 + $0x850] sm:$0xff] }
 0x13f   :  { %2706 = vmatpush1.bf16.msra.mxu0 %v3084_v60  ;;  %2829 = vmatpush1.bf16.msra.mxu1 %v3086_v62  ;;  %v284_v60 = vld [vmem:[#allocation5 + $0x6b0] sm:$0xff]  ;;  %v281_v62 = vld [vmem:[#allocation5 + $0x698] sm:$0xff] }
 0x140   :  { %2707 = vmatprep.subr.bf16.mxu0 %v3093_v63  ;;  %2830 = vmatprep.subr.bf16.mxu1 %v3095_v0  ;;  %v285_v63 = vld [vmem:[#allocation5 + $0x6b8] sm:$0xff]  ;;  %v3148_v0 = vcombine.low %v272_v50, %v276_v51  ;;  %v3157_v2 = vcombine.high %v280_v59, %v284_v60 }
 0x141   :  { %v3159_v3 = vcombine.high %v281_v62, %v285_v63  ;;  %v3158_v8 = vcombine.low %v281_v62, %v285_v63  ;;  %v344_v63 = vld [vmem:[#allocation5 + $0x890] sm:$0xff] }
 0x143   :  { %2708 = vmatpush1.bf16.msra.mxu0 %v3092_v5  ;;  %2831 = vmatpush1.bf16.msra.mxu1 %v3094_v15  ;;  %v292_v5 = vld [vmem:[#allocation5 + $0x6f0] sm:$0xff]  ;;  %v289_v15 = vld [vmem:[#allocation5 + $0x6d8] sm:$0xff] }
 0x144   :  { %2709 = vmatprep.subr.bf16.mxu0 %v3101_v61  ;;  %2832 = vmatprep.subr.bf16.mxu1 %v3103_v6  ;;  %v293_v61 = vld [vmem:[#allocation5 + $0x6f8] sm:$0xff]  ;;  %v3156_v6 = vcombine.low %v280_v59, %v284_v60  ;;  %v3165_v9 = vcombine.high %v288_v4, %v292_v5 }
 0x145   :  { %v3167_v10 = vcombine.high %v289_v15, %v293_v61  ;;  %v3166_v16 = vcombine.low %v289_v15, %v293_v61  ;;  %v352_v61 = vld [vmem:[#allocation5 + $0x8d0] sm:$0xff] }
 0x147   :  { %2710 = vmatpush1.bf16.msra.mxu0 %v3100_v12  ;;  %2833 = vmatpush1.bf16.msra.mxu1 %v3102_v13  ;;  %v300_v12 = vld [vmem:[#allocation5 + $0x730] sm:$0xff]  ;;  %v297_v13 = vld [vmem:[#allocation5 + $0x718] sm:$0xff] }
 0x148   :  { %2711 = vmatprep.subr.bf16.mxu0 %v3109_v14  ;;  %2834 = vmatprep.subr.bf16.mxu1 %v3111_v24  ;;  %v301_v14 = vld [vmem:[#allocation5 + $0x738] sm:$0xff]  ;;  %v3164_v24 = vcombine.low %v288_v4, %v292_v5  ;;  %v3173_v17 = vcombine.high %v296_v11, %v300_v12 }
 0x149   :  { %v3175_v19 = vcombine.high %v297_v13, %v301_v14  ;;  %v3174_v26 = vcombine.low %v297_v13, %v301_v14  ;;  %v360_v13 = vld [vmem:[#allocation5 + $0x910] sm:$0xff] }
 0x14a   :  { %v364_v14 = vld [vmem:[#allocation5 + $0x930] sm:$0xff] }
 0x14b   :  { %2712 = vmatpush1.bf16.msra.mxu0 %v3108_v21  ;;  %2835 = vmatpush1.bf16.msra.mxu1 %v3110_v22  ;;  %v308_v21 = vld [vmem:[#allocation5 + $0x770] sm:$0xff]  ;;  %v305_v22 = vld [vmem:[#allocation5 + $0x758] sm:$0xff] }
 0x14c   :  { %2713 = vmatprep.subr.bf16.mxu0 %v3117_v23  ;;  %2836 = vmatprep.subr.bf16.mxu1 %v3119_v25  ;;  %v309_v23 = vld [vmem:[#allocation5 + $0x778] sm:$0xff]  ;;  %v3172_v25 = vcombine.low %v296_v11, %v300_v12  ;;  %v3181_v27 = vcombine.high %v304_v20, %v308_v21 }
 0x14d   :  { %v3183_v28 = vcombine.high %v305_v22, %v309_v23  ;;  %v3182_v34 = vcombine.low %v305_v22, %v309_v23  ;;  %v372_v22 = vld [vmem:[#allocation5 + $0x970] sm:$0xff]  ;;  %v369_v23 = vld [vmem:[#allocation5 + $0x958] sm:$0xff] }
 0x14f   :  { %2714 = vmatpush1.bf16.msra.mxu0 %v3116_v30  ;;  %2837 = vmatpush1.bf16.msra.mxu1 %v3118_v31  ;;  %v316_v30 = vld [vmem:[#allocation5 + $0x7b0] sm:$0xff]  ;;  %v313_v31 = vld [vmem:[#allocation5 + $0x798] sm:$0xff] }
 0x150   :  { %2715 = vmatprep.subr.bf16.mxu0 %v3125_v32  ;;  %2838 = vmatprep.subr.bf16.mxu1 %v3127_v33  ;;  %v317_v32 = vld [vmem:[#allocation5 + $0x7b8] sm:$0xff]  ;;  %v3180_v33 = vcombine.low %v304_v20, %v308_v21  ;;  %v3189_v36 = vcombine.high %v312_v29, %v316_v30  ;;  %v3237_v20 = vcombine.high %v360_v13, %v364_v14  ;;  %v368_v21 = vld [vmem:[#allocation5 + $0x950] sm:$0xff] }
 0x151   :  { %v3191_v37 = vcombine.high %v313_v31, %v317_v32  ;;  %v3190_v43 = vcombine.low %v313_v31, %v317_v32  ;;  %v380_v31 = vld [vmem:[#allocation5 + $0x9b0] sm:$0xff]  ;;  %v377_v32 = vld [vmem:[#allocation5 + $0x998] sm:$0xff] }
 0x153   :  { %2716 = vmatpush1.bf16.msra.mxu0 %v3124_v38  ;;  %2839 = vmatpush1.bf16.msra.mxu1 %v3126_v40  ;;  %v324_v38 = vld [vmem:[#allocation5 + $0x7f0] sm:$0xff]  ;;  %v321_v40 = vld [vmem:[#allocation5 + $0x7d8] sm:$0xff] }
 0x154   :  { %2717 = vmatprep.subr.bf16.mxu0 %v3133_v41  ;;  %2840 = vmatprep.subr.bf16.mxu1 %v3135_v42  ;;  %v325_v41 = vld [vmem:[#allocation5 + $0x7f8] sm:$0xff]  ;;  %v3188_v42 = vcombine.low %v312_v29, %v316_v30  ;;  %v3197_v44 = vcombine.high %v320_v7, %v324_v38  ;;  %v376_v30 = vld [vmem:[#allocation5 + $0x990] sm:$0xff] }
 0x155   :  { %v3199_v45 = vcombine.high %v321_v40, %v325_v41  ;;  %v3198_v50 = vcombine.low %v321_v40, %v325_v41  ;;  %v388_v40 = vld [vmem:[#allocation5 + $0x9f0] sm:$0xff]  ;;  %v385_v41 = vld [vmem:[#allocation5 + $0x9d8] sm:$0xff] }
 0x157   :  { %2718 = vmatpush1.bf16.msra.mxu0 %v3132_v47  ;;  %2841 = vmatpush1.bf16.msra.mxu1 %v3134_v48  ;;  %v332_v47 = vld [vmem:[#allocation5 + $0x830] sm:$0xff]  ;;  %v329_v48 = vld [vmem:[#allocation5 + $0x818] sm:$0xff] }
 0x158   :  { %2719 = vmatprep.subr.bf16.mxu0 %v3141_v49  ;;  %2842 = vmatprep.subr.bf16.mxu1 %v3143_v18  ;;  %v333_v49 = vld [vmem:[#allocation5 + $0x838] sm:$0xff]  ;;  %v3196_v18 = vcombine.low %v320_v7, %v324_v38  ;;  %v3205_v51 = vcombine.high %v328_v46, %v332_v47  ;;  %v384_v38 = vld [vmem:[#allocation5 + $0x9d0] sm:$0xff] }
 0x159   :  { %v3207_v52 = vcombine.high %v329_v48, %v333_v49  ;;  %v3206_v59 = vcombine.low %v329_v48, %v333_v49  ;;  %v396_v48 = vld [vmem:[#allocation5 + $0xa30] sm:$0xff]  ;;  %v393_v49 = vld [vmem:[#allocation5 + $0xa18] sm:$0xff] }
 0x15b   :  { %2720 = vmatpush1.bf16.msra.mxu0 %v3140_v55  ;;  %2843 = vmatpush1.bf16.msra.mxu1 %v3142_v56  ;;  %v340_v55 = vld [vmem:[#allocation5 + $0x870] sm:$0xff]  ;;  %v337_v56 = vld [vmem:[#allocation5 + $0x858] sm:$0xff] }
 0x15c   :  { %2721 = vmatprep.subr.bf16.mxu0 %v3149_v57  ;;  %2844 = vmatprep.subr.bf16.mxu1 %v3151_v58  ;;  %v341_v57 = vld [vmem:[#allocation5 + $0x878] sm:$0xff]  ;;  %v3204_v58 = vcombine.low %v328_v46, %v332_v47  ;;  %v3213_v60 = vcombine.high %v336_v54, %v340_v55  ;;  %v392_v47 = vld [vmem:[#allocation5 + $0xa10] sm:$0xff] }
 0x15d   :  { %v3215_v62 = vcombine.high %v337_v56, %v341_v57  ;;  %v3214_v4 = vcombine.low %v337_v56, %v341_v57  ;;  %v404_v56 = vld [vmem:[#allocation5 + $0xa70] sm:$0xff]  ;;  %v401_v57 = vld [vmem:[#allocation5 + $0xa58] sm:$0xff] }
 0x15f   :  { %2722 = vmatpush1.bf16.msra.mxu0 %v3148_v0  ;;  %2845 = vmatpush1.bf16.msra.mxu1 %v3150_v1  ;;  %v348_v0 = vld [vmem:[#allocation5 + $0x8b0] sm:$0xff]  ;;  %v345_v1 = vld [vmem:[#allocation5 + $0x898] sm:$0xff] }
 0x160   :  { %2723 = vmatprep.subr.bf16.mxu0 %v3157_v2  ;;  %2846 = vmatprep.subr.bf16.mxu1 %v3159_v3  ;;  %v349_v2 = vld [vmem:[#allocation5 + $0x8b8] sm:$0xff]  ;;  %v3212_v3 = vcombine.low %v336_v54, %v340_v55  ;;  %v3221_v5 = vcombine.high %v344_v63, %v348_v0  ;;  %v400_v55 = vld [vmem:[#allocation5 + $0xa50] sm:$0xff] }
 0x161   :  { %v3223_v15 = vcombine.high %v345_v1, %v349_v2 }
 0x163   :  { %2724 = vmatpush1.bf16.msra.mxu0 %v3156_v6  ;;  %2847 = vmatpush1.bf16.msra.mxu1 %v3158_v8  ;;  %v356_v6 = vld [vmem:[#allocation5 + $0x8f0] sm:$0xff]  ;;  %v353_v8 = vld [vmem:[#allocation5 + $0x8d8] sm:$0xff] }
 0x164   :  { %2725 = vmatprep.subr.bf16.mxu0 %v3165_v9  ;;  %2848 = vmatprep.subr.bf16.mxu1 %v3167_v10  ;;  %v357_v9 = vld [vmem:[#allocation5 + $0x8f8] sm:$0xff]  ;;  %v3220_v10 = vcombine.low %v344_v63, %v348_v0  ;;  %v3229_v11 = vcombine.high %v352_v61, %v356_v6  ;;  %v408_v0 = vld [vmem:[#allocation5 + $0xa90] sm:$0xff] }
 0x165   :  { %v3231_v12 = vcombine.high %v353_v8, %v357_v9 }
 0x167   :  { %2726 = vmatpush1.bf16.msra.mxu0 %v3164_v24  ;;  %2849 = vmatpush1.bf16.msra.mxu1 %v3166_v16  ;;  %v361_v24 = vld [vmem:[#allocation5 + $0x918] sm:$0xff] }
 0x168   :  { %2727 = vmatprep.subr.bf16.mxu0 %v3173_v17  ;;  %2850 = vmatprep.subr.bf16.mxu1 %v3175_v19  ;;  %v365_v16 = vld [vmem:[#allocation5 + $0x938] sm:$0xff]  ;;  %v3228_v17 = vcombine.low %v352_v61, %v356_v6  ;;  %v3230_v19 = vcombine.low %v353_v8, %v357_v9  ;;  %v416_v6 = vld [vmem:[#allocation5 + $0xad0] sm:$0xff] }
 0x169   :  { %v420_v8 = vld [vmem:[#allocation5 + $0xaf0] sm:$0xff]  ;;  %v417_v9 = vld [vmem:[#allocation5 + $0xad8] sm:$0xff] }
 0x16b   :  { %2728 = vmatpush1.bf16.msra.mxu0 %v3172_v25  ;;  %2851 = vmatpush1.bf16.msra.mxu1 %v3174_v26  ;;  %v373_v25 = vld [vmem:[#allocation5 + $0x978] sm:$0xff]  ;;  %v3236_v26 = vcombine.low %v360_v13, %v364_v14  ;;  %v424_v14 = vld [vmem:[#allocation5 + $0xb10] sm:$0xff] }
 0x16c   :  { %2729 = vmatprep.subr.bf16.mxu0 %v3181_v27  ;;  %2852 = vmatprep.subr.bf16.mxu1 %v3183_v28  ;;  %v3238_v27 = vcombine.low %v361_v24, %v365_v16  ;;  %v3245_v28 = vcombine.high %v368_v21, %v372_v22  ;;  %v3247_v29 = vcombine.high %v369_v23, %v373_v25 }
 0x16f   :  { %2730 = vmatpush1.bf16.msra.mxu0 %v3180_v33  ;;  %2853 = vmatpush1.bf16.msra.mxu1 %v3182_v34  ;;  %v381_v33 = vld [vmem:[#allocation5 + $0x9b8] sm:$0xff]  ;;  %v3244_v34 = vcombine.low %v368_v21, %v372_v22  ;;  %v432_v22 = vld [vmem:[#allocation5 + $0xb50] sm:$0xff] }
 0x170   :  { %2731 = vmatprep.subr.bf16.mxu0 %v3189_v36  ;;  %2854 = vmatprep.subr.bf16.mxu1 %v3191_v37  ;;  %v3246_v36 = vcombine.low %v369_v23, %v373_v25  ;;  %v3253_v37 = vcombine.high %v376_v30, %v380_v31  ;;  %v3255_v7 = vcombine.high %v377_v32, %v381_v33  ;;  %v436_v23 = vld [vmem:[#allocation5 + $0xb70] sm:$0xff]  ;;  %v433_v25 = vld [vmem:[#allocation5 + $0xb58] sm:$0xff] }
 0x173   :  { %2732 = vmatpush1.bf16.msra.mxu0 %v3188_v42  ;;  %2855 = vmatpush1.bf16.msra.mxu1 %v3190_v43  ;;  %v389_v42 = vld [vmem:[#allocation5 + $0x9f8] sm:$0xff]  ;;  %v3252_v43 = vcombine.low %v376_v30, %v380_v31  ;;  %v440_v31 = vld [vmem:[#allocation5 + $0xb90] sm:$0xff] }
 0x174   :  { %2733 = vmatprep.subr.bf16.mxu0 %v3197_v44  ;;  %2856 = vmatprep.subr.bf16.mxu1 %v3199_v45  ;;  %v3254_v44 = vcombine.low %v377_v32, %v381_v33  ;;  %v3261_v45 = vcombine.high %v384_v38, %v388_v40  ;;  %v3263_v46 = vcombine.high %v385_v41, %v389_v42  ;;  %v444_v32 = vld [vmem:[#allocation5 + $0xbb0] sm:$0xff]  ;;  %v441_v33 = vld [vmem:[#allocation5 + $0xb98] sm:$0xff] }
 0x177   :  { %2734 = vmatpush1.bf16.msra.mxu0 %v3196_v18  ;;  %2857 = vmatpush1.bf16.msra.mxu1 %v3198_v50  ;;  %v397_v18 = vld [vmem:[#allocation5 + $0xa38] sm:$0xff]  ;;  %v3260_v50 = vcombine.low %v384_v38, %v388_v40  ;;  %v448_v40 = vld [vmem:[#allocation5 + $0xbd0] sm:$0xff] }
 0x178   :  { %2744 = vmatprep.subr.bf16.mxu0 %v3205_v51  ;;  %2867 = vmatprep.subr.bf16.mxu1 %v3207_v52  ;;  %v3262_v51 = vcombine.low %v385_v41, %v389_v42  ;;  %v3269_v52 = vcombine.high %v392_v47, %v396_v48  ;;  %v3271_v54 = vcombine.high %v393_v49, %v397_v18  ;;  %v452_v41 = vld [vmem:[#allocation5 + $0xbf0] sm:$0xff]  ;;  %v449_v42 = vld [vmem:[#allocation5 + $0xbd8] sm:$0xff] }
 0x17a   :  { %2736 = vmatmul.mubr.bf16.vlgmr.msra.gmra.mrb[4].mxu0 %v3561_v53  ;;  %2859 = vmatmul.mubr.bf16.vlgmr.msra.gmra.mrb[4].mxu1 %v3561_v53  ;;  %v3222_v53 = vcombine.low %v345_v1, %v349_v2  ;;  %v412_v1 = vld [vmem:[#allocation5 + $0xab0] sm:$0xff]  ;;  %v409_v2 = vld [vmem:[#allocation5 + $0xa98] sm:$0xff] }
 0x17b   :  { %2745 = vmatpush1.bf16.msra.mxu0 %v3204_v58  ;;  %2868 = vmatpush1.bf16.msra.mxu1 %v3206_v59  ;;  %v405_v58 = vld [vmem:[#allocation5 + $0xa78] sm:$0xff]  ;;  %v3268_v59 = vcombine.low %v392_v47, %v396_v48  ;;  %v3324_v48 = vcombine.low %v448_v40, %v452_v41 }
 0x17c   :  { %2746 = vmatprep.subr.bf16.mxu0 %v3213_v60  ;;  %2869 = vmatprep.subr.bf16.mxu1 %v3215_v62  ;;  %v3270_v60 = vcombine.low %v393_v49, %v397_v18  ;;  %v3277_v62 = vcombine.high %v400_v55, %v404_v56  ;;  %v3279_v63 = vcombine.high %v401_v57, %v405_v58  ;;  %v456_v18 = vlaneseq }
 0x17d   :  { %2776 = vmatprep.mubr.bf16.mxu0 %v3563_v35  ;;  %2899 = vmatprep.mubr.bf16.mxu1 %v3563_v35  ;;  %v3239_v35 = vcombine.high %v361_v24, %v365_v16  ;;  %v428_v24 = vld [vmem:[#allocation5 + $0xb30] sm:$0xff]  ;;  %v425_v16 = vld [vmem:[#allocation5 + $0xb18] sm:$0xff] }
 0x17f   :  { %2747 = vmatpush1.bf16.msra.mxu0 %v3212_v3  ;;  %2870 = vmatpush1.bf16.msra.mxu1 %v3214_v4  ;;  %v413_v3 = vld [vmem:[#allocation5 + $0xab8] sm:$0xff]  ;;  %v3276_v4 = vcombine.low %v400_v55, %v404_v56 }
 0x180   :  { %2748 = vmatprep.subr.bf16.mxu0 %v3221_v5  ;;  %2871 = vmatprep.subr.bf16.mxu1 %v3223_v15  ;;  %v3278_v5 = vcombine.low %v401_v57, %v405_v58  ;;  %v3285_v15 = vcombine.high %v408_v0, %v412_v1  ;;  %v3287_v61 = vcombine.high %v409_v2, %v413_v3 }
 0x183   :  { %2749 = vmatpush1.bf16.msra.mxu0 %v3220_v10  ;;  %2872 = vmatpush1.bf16.msra.mxu1 %v3222_v53  ;;  %v421_v10 = vld [vmem:[#allocation5 + $0xaf8] sm:$0xff]  ;;  %v3284_v53 = vcombine.low %v408_v0, %v412_v1 }
 0x184   :  { %2750 = vmatprep.subr.bf16.mxu0 %v3229_v11  ;;  %2873 = vmatprep.subr.bf16.mxu1 %v3231_v12  ;;  %v3286_v11 = vcombine.low %v409_v2, %v413_v3  ;;  %v3293_v12 = vcombine.high %v416_v6, %v420_v8  ;;  %v3295_v13 = vcombine.high %v417_v9, %v421_v10 }
 0x187   :  { %2751 = vmatpush1.bf16.msra.mxu0 %v3228_v17  ;;  %2874 = vmatpush1.bf16.msra.mxu1 %v3230_v19  ;;  %v429_v17 = vld [vmem:[#allocation5 + $0xb38] sm:$0xff]  ;;  %v3292_v19 = vcombine.low %v416_v6, %v420_v8 }
 0x188   :  { %2752 = vmatprep.subr.bf16.mxu0 %v3237_v20  ;;  %2875 = vmatprep.subr.bf16.mxu1 %v3239_v35  ;;  %v3294_v20 = vcombine.low %v417_v9, %v421_v10  ;;  %v3301_v35 = vcombine.high %v424_v14, %v428_v24  ;;  %v3303_v21 = vcombine.high %v425_v16, %v429_v17 }
 0x18b   :  { %2753 = vmatpush1.bf16.msra.mxu0 %v3236_v26  ;;  %2876 = vmatpush1.bf16.msra.mxu1 %v3238_v27  ;;  %v437_v26 = vld [vmem:[#allocation5 + $0xb78] sm:$0xff]  ;;  %v3300_v27 = vcombine.low %v424_v14, %v428_v24 }
 0x18c   :  { %2754 = vmatprep.subr.bf16.mxu0 %v3245_v28  ;;  %2877 = vmatprep.subr.bf16.mxu1 %v3247_v29  ;;  %v3302_v28 = vcombine.low %v425_v16, %v429_v17  ;;  %v3309_v29 = vcombine.high %v432_v22, %v436_v23  ;;  %v3311_v30 = vcombine.high %v433_v25, %v437_v26 }
 0x18f   :  { %2755 = vmatpush1.bf16.msra.mxu0 %v3244_v34  ;;  %2878 = vmatpush1.bf16.msra.mxu1 %v3246_v36  ;;  %v445_v34 = vld [vmem:[#allocation5 + $0xbb8] sm:$0xff]  ;;  %v3308_v36 = vcombine.low %v432_v22, %v436_v23 }
 0x190   :  { %2756 = vmatprep.subr.bf16.mxu0 %v3253_v37  ;;  %2879 = vmatprep.subr.bf16.mxu1 %v3255_v7  ;;  %v3310_v37 = vcombine.low %v433_v25, %v437_v26  ;;  %v3317_v7 = vcombine.high %v440_v31, %v444_v32  ;;  %v3319_v38 = vcombine.high %v441_v33, %v445_v34 }
 0x193   :  { %2757 = vmatpush1.bf16.msra.mxu0 %v3252_v43  ;;  %2880 = vmatpush1.bf16.msra.mxu1 %v3254_v44  ;;  %v453_v43 = vld [vmem:[#allocation5 + $0xbf8] sm:$0xff]  ;;  %v3316_v44 = vcombine.low %v440_v31, %v444_v32 }
 0x194   :  { %2758 = vmatprep.subr.bf16.mxu0 %v3261_v45  ;;  %2881 = vmatprep.subr.bf16.mxu1 %v3263_v46  ;;  %v3318_v45 = vcombine.low %v441_v33, %v445_v34  ;;  %v3325_v46 = vcombine.high %v448_v40, %v452_v41  ;;  %v3327_v47 = vcombine.high %v449_v42, %v453_v43 }
 0x195   :  { %v3326_v49 = vcombine.low %v449_v42, %v453_v43 }
 0x197   :  { %2759 = vmatpush1.bf16.msra.mxu0 %v3260_v50  ;;  %2882 = vmatpush1.bf16.msra.mxu1 %v3262_v51  ;;  %v457_v50 = vshrl.u32 %v456_v18, 7 }
 0x198   :  { %2760 = vmatprep.subr.bf16.mxu0 %v3269_v52  ;;  %2883 = vmatprep.subr.bf16.mxu1 %v3271_v54  ;;  %v454_v52 = vld [vmem:[#allocation7] sm:$0xff] }
 0x199   :  { %v458_v51 = vsub.s32 0, %v457_v50  ;;  %v466_v54 = vsub.s32 2, %v457_v50  ;;  %v462_v55 = vsub.s32 1, %v457_v50  ;;  %v470_v56 = vsub.s32 3, %v457_v50 }
 0x19a   :  { %v474_v10 = vsub.s32 4, %v457_v50 }
 0x19b   :  { %2761 = vmatpush1.bf16.msra.mxu0 %v3268_v59  ;;  %2884 = vmatpush1.bf16.msra.mxu1 %v3270_v60  ;;  %v459_v57 = vrot.slane %v454_v52, %v458_v51  ;;  %v467_v58 = vrot.slane %v454_v52, %v466_v54  ;;  %v463_v59 = vrot.slane %v454_v52, %v462_v55 }
 0x19c   :  { %2762 = vmatprep.subr.bf16.mxu0 %v3277_v62  ;;  %2885 = vmatprep.subr.bf16.mxu1 %v3279_v63  ;;  %v471_v60 = vrot.slane %v454_v52, %v470_v56 }
 0x19f   :  { %2763 = vmatpush1.bf16.msra.mxu0 %v3276_v4  ;;  %2886 = vmatpush1.bf16.msra.mxu1 %v3278_v5 }
 0x1a0   :  { %2764 = vmatprep.subr.bf16.mxu0 %v3285_v15  ;;  %2887 = vmatprep.subr.bf16.mxu1 %v3287_v61 }
 0x1a3   :  { %2765 = vmatpush1.bf16.msra.mxu0 %v3284_v53  ;;  %2888 = vmatpush1.bf16.msra.mxu1 %v3286_v11  ;;  %v482_v53 = vsub.s32 6, %v457_v50  ;;  %v478_v11 = vsub.s32 5, %v457_v50 }
 0x1a4   :  { %2766 = vmatprep.subr.bf16.mxu0 %v3293_v12  ;;  %2889 = vmatprep.subr.bf16.mxu1 %v3295_v13  ;;  %v486_v12 = vsub.s32 7, %v457_v50  ;;  %v475_v13 = vrot.slane %v454_v52, %v474_v10 }
 0x1a5   :  { %v483_v14 = vrot.slane %v454_v52, %v482_v53  ;;  %v479_v24 = vrot.slane %v454_v52, %v478_v11 }
 0x1a6   :  { %v487_v16 = vrot.slane %v454_v52, %v486_v12 }
 0x1a7   :  { %2767 = vmatpush1.bf16.msra.mxu0 %v3292_v19  ;;  %2890 = vmatpush1.bf16.msra.mxu1 %v3294_v20 }
 0x1a8   :  { %2768 = vmatprep.subr.bf16.mxu0 %v3301_v35  ;;  %2891 = vmatprep.subr.bf16.mxu1 %v3303_v21 }
 0x1ab   :  { %2769 = vmatpush1.bf16.msra.mxu0 %v3300_v27  ;;  %2892 = vmatpush1.bf16.msra.mxu1 %v3302_v28 }
 0x1ac   :  { %2770 = vmatprep.subr.bf16.mxu0 %v3309_v29  ;;  %2893 = vmatprep.subr.bf16.mxu1 %v3311_v30 }
 0x1af   :  { %2771 = vmatpush1.bf16.msra.mxu0 %v3308_v36  ;;  %2894 = vmatpush1.bf16.msra.mxu1 %v3310_v37 }
 0x1b0   :  { %2772 = vmatprep.subr.bf16.mxu0 %v3317_v7  ;;  %2895 = vmatprep.subr.bf16.mxu1 %v3319_v38 }
 0x1b3   :  { %2773 = vmatpush1.bf16.msra.mxu0 %v3316_v44  ;;  %2896 = vmatpush1.bf16.msra.mxu1 %v3318_v45 }
 0x1b4   :  { %2774 = vmatprep.subr.bf16.mxu0 %v3325_v46  ;;  %2897 = vmatprep.subr.bf16.mxu1 %v3327_v47 }
 0x1b7   :  { %2775 = vmatpush1.bf16.msra.mxu0 %v3324_v48  ;;  %2898 = vmatpush1.bf16.msra.mxu1 %v3326_v49 }
 0x1ba   :  { %2777 = vmatmul.mubr.bf16.vlgmr.msra.gmra.mrb[4].mxu0 %v3571_v39  ;;  %2900 = vmatmul.mubr.bf16.vlgmr.msra.gmra.mrb[4].mxu1 %v3571_v39 }
 0x1cd   :  { %v2532_v62 = vpop.f32.mrb[0].mxu0  ;;  %v2655_v0 = vpop.f32.mrb[0].mxu1 }
 0x1ce   :  { %v3328_v63 = vadd.f32 %v2532_v62, %v459_v57  ;;  %v2534_v1 = vpop.f32.mrb[1].mxu0  ;;  %v3330_v2 = vadd.f32 %v2655_v0, %v467_v58  ;;  %v2657_v4 = vpop.f32.mrb[1].mxu1 }
 0x1cf   :  { %v3329_v3 = vadd.f32 %v2534_v1, %v463_v59  ;;  %v2536_v5 = vpop.f32.mrb[2].mxu0  ;;  %v3331_v39 = vadd.f32 %v2657_v4, %v471_v60  ;;  %v2659_v15 = vpop.f32.mrb[2].mxu1 }
 0x1d0   :  { %v2537_v61 = vpop.f32.mrb[3].mxu0  ;;  %v2660_v8 = vpop.f32.mrb[3].mxu1 }
 0x1d1   :  { %v2916_v6 = vcombine.low %v3328_v63, %v3329_v3  ;;  %v2917_v9 = vcombine.low %v3330_v2, %v3331_v39 }
 0x1d3   :  { %2924 = vst [vmem:[#allocation8] sm:$0xff] %v2916_v6  ;;  %2925 = vst [vmem:[#allocation8 + $0x8] sm:$0xff] %v2917_v9 }
 0x28d   :  { %v2778_v17 = vpop.f32.mrb[4].mxu0  ;;  %v2901_v20 = vpop.f32.mrb[4].mxu1 }
 0x28e   :  { %v3332_v19 = vadd.f32 %v2778_v17, %v475_v13  ;;  %v2780_v35 = vpop.f32.mrb[5].mxu0  ;;  %v3334_v21 = vadd.f32 %v2901_v20, %v483_v14  ;;  %v2903_v23 = vpop.f32.mrb[5].mxu1 }
 0x28f   :  { %v3333_v22 = vadd.f32 %v2780_v35, %v479_v24  ;;  %v2782_v25 = vpop.f32.mrb[6].mxu0  ;;  %v3335_v26 = vadd.f32 %v2903_v23, %v487_v16  ;;  %v2905_v27 = vpop.f32.mrb[6].mxu1 }
 0x290   :  { %v2783_v28 = vpop.f32.mrb[7].mxu0  ;;  %v2906_v30 = vpop.f32.mrb[7].mxu1 }
 0x291   :  { %v2918_v29 = vcombine.low %v3332_v19, %v3333_v22  ;;  %v2919_v31 = vcombine.low %v3334_v21, %v3335_v26 }
 0x293   :  { %2926 = vst [vmem:[#allocation8 + $0x10] sm:$0xff] %v2918_v29  ;;  %2927 = vst [vmem:[#allocation8 + $0x18] sm:$0xff] %v2919_v31 }
 0x294   :  { %3454 = shalt.err (!%p3451_p0)
}
 0x295   :  { %s3455_s25 = scalar_lea.hbm %s3602_s3, 512 }
 0x296   :  { %p3456_p1 = scmp.ne.s32.totalorder %s3602_s3, %s3455_s25  ;;  %p3459_p2 = scmp.lt.u32.totalorder %s3455_s25, %s3602_s3 }
 0x298   :  { %p3461_p3 = pnand %p3459_p2, %p3456_p1 }
 0x29a   :  { %3464 = shalt.err (!%p3461_p3)
}
 0x29b   :  { %2937 = dma.vmem_to_hbm [thread:$0]  %s2935_s21, 512, %s3602_s3, [#allocation4]  }
 0x29c   :  { %3469 = dma.done.wait [#allocation4], 512  }
 0x29d   :  { %3470 = vsyncadd [#allocation4], 4294966784 }
 0x29e   :  { %2941 = vsyncpa [#allocation3], 1 }
 0x29f   :  { %2942 = vsyncpa [#allocation6], 1 }
 0x2a0   :  { %2943 = vsyncpa [#allocation4], 1 }

</bundles_post_ra>
